<compile_context>
chip_gen: v5e
topology: v5e:2x2
jax: 0.10.0
libtpu: 0.0.40
codegen_flags: <defaults>
</compile_context>

<pallas_src>
import functools

import jax
import jax.numpy as jnp
from jax.experimental import pallas as pl
from jax.experimental.pallas import tpu as pltpu


def sakt_kernel(e_ref, x_ref,
                wq_ref, bq_ref, wk_ref, bk_ref, wv_ref, bv_ref,
                wo_ref, bo_ref,
                ln_g_ref, ln_b_ref,
                w1_ref, b1_ref, w2_ref, b2_ref,
                wp_ref, bp_ref,
                out_ref, attw_ref,
                *, num_heads):
    Bt, S, E = e_ref.shape
    dh = E // num_heads
    M = Bt * S

    # Flatten (B_TILE, S, E) -> (B_TILE*S, E) for all dense matmuls.
    e2 = e_ref[...].reshape(M, E)          # query-side embeddings (question ids)
    x2 = x_ref[...].reshape(M, E)          # key/value-side embeddings (interaction + pos)

    # In-projections. Weights are pre-transposed in the wrapper, so
    # y = x @ W + b  ==  PyTorch Linear's  y = x @ W^T + b.
    q = jnp.dot(e2, wq_ref[...], preferred_element_type=jnp.float32) + bq_ref[...]
    k = jnp.dot(x2, wk_ref[...], preferred_element_type=jnp.float32) + bk_ref[...]
    v = jnp.dot(x2, wv_ref[...], preferred_element_type=jnp.float32) + bv_ref[...]

    # Causal ("future") mask: True strictly above the diagonal -> masked out.
    row = jax.lax.broadcasted_iota(jnp.int32, (S, S), 0)
    col = jax.lax.broadcasted_iota(jnp.int32, (S, S), 1)
    masked = (col > row)[None, :, :]
    neg = jnp.float32(-1e30)
    scale = jnp.float32(1.0 / (dh ** 0.5))

    attn_sum = jnp.zeros((Bt, S, S), jnp.float32)
    att_proj = jnp.zeros((M, E), jnp.float32)
    for h in range(num_heads):
        sl = slice(h * dh, (h + 1) * dh)
        qh = (q[:, sl] * scale).reshape(Bt, S, dh)
        kh = k[:, sl].reshape(Bt, S, dh)
        vh = v[:, sl].reshape(Bt, S, dh)

        # Batched scores, no explicit transpose (contract on last dims).
        s = jnp.einsum('bqd,bkd->bqk', qh, kh, preferred_element_type=jnp.float32)
        s = jnp.where(masked, neg, s)
        s = s - jnp.max(s, axis=-1, keepdims=True)
        p = jnp.exp(s)
        p = p * pl.reciprocal(jnp.sum(p, axis=-1, keepdims=True), approx=True)

        attn_sum = attn_sum + p
        o = jnp.einsum('bqk,bkd->bqd', p, vh, preferred_element_type=jnp.float32)

        # Fold the out-projection into the head loop: avoids jnp.concatenate
        # of dh-wide lane slices (wo rows are sublane-aligned static slices).
        att_proj = att_proj + jnp.dot(o.reshape(M, dh), wo_ref[sl, :],
                                      preferred_element_type=jnp.float32)

    # Attention weights averaged over heads (PyTorch average_attn_weights=True).
    attw_ref[...] = attn_sum * jnp.float32(1.0 / num_heads)

    att = att_proj + bo_ref[...]

    def layer_norm(y):
        mu = jnp.mean(y, axis=-1, keepdims=True)
        var = jnp.mean((y - mu) ** 2, axis=-1, keepdims=True)
        return (y - mu) * jax.lax.rsqrt(var + 1e-5) * ln_g_ref[...] + ln_b_ref[...]

    h1 = layer_norm(att + e2)                                   # (M, E)

    # FFN: lr1 -> (dropout = id) -> relu -> lr2 -> (dropout = id)
    f = jnp.dot(h1, w1_ref[...], preferred_element_type=jnp.float32) + b1_ref[...]
    f = jnp.maximum(f, 0.0)
    f = jnp.dot(f, w2_ref[...], preferred_element_type=jnp.float32) + b2_ref[...]

    h2 = layer_norm(f + h1)                                     # (M, E)

    # Pred head Linear(E, 1) as a lane-dense VPU reduction: no (E,1) MXU matmul,
    # no last-dim-1 masked stores. Output block is (B_TILE, S).
    logits = jnp.sum(h2.reshape(Bt, S, E) * wp_ref[...], axis=-1) + bp_ref[...]
    out_ref[...] = logits


def sakt_pallas(e_emb, x_emb, params, num_heads, batch_tile=8):
    B, S, E = e_emb.shape
    bt = min(batch_tile, B)
    nb = pl.cdiv(B, bt)
    B_pad = nb * bt
    if B_pad != B:
        pad = ((0, B_pad - B), (0, 0), (0, 0))
        e_emb = jnp.pad(e_emb, pad)
        x_emb = jnp.pad(x_emb, pad)

    # Pre-transpose dense weights ONCE in the wrapper so the kernel never
    # re-transposes grid-invariant data (feedback: zero in-kernel .T's).
    weight_arrays = [
        params["wq"].T, params["bq"], params["wk"].T, params["bk"],
        params["wv"].T, params["bv"], params["wo"].T, params["bo"],
        params["ln_g"], params["ln_b"],
        params["w1"].T, params["b1"], params["w2"].T, params["b2"],
        params["wp"], params["bp"],       # wp stays (1, E) for the VPU reduction
    ]

    # Grid-invariant weights: constant index_map (compiler keeps them resident).
    def full_spec(arr):
        nd = arr.ndim
        return pl.BlockSpec(arr.shape, lambda b, _nd=nd: (0,) * _nd)

    seq_spec = pl.BlockSpec((bt, S, E), lambda b: (b, 0, 0))
    in_specs = [seq_spec, seq_spec] + [full_spec(w) for w in weight_arrays]

    # Logits stored as (nb, bt, S) so the stored block (bt, S) is lane-dense in S
    # and tiling constraints on the last two dims are trivially satisfied.
    out_shape = (jax.ShapeDtypeStruct((nb, bt, S), jnp.float32),
                 jax.ShapeDtypeStruct((B_pad, S, S), jnp.float32))
    out_specs = (pl.BlockSpec((None, bt, S), lambda b: (b, 0, 0)),
                 pl.BlockSpec((bt, S, S), lambda b: (b, 0, 0)))

    kernel = functools.partial(sakt_kernel, num_heads=num_heads)
    logits, attw = pl.pallas_call(
        kernel,
        out_shape=out_shape,
        grid_spec=pltpu.PrefetchScalarGridSpec(
            num_scalar_prefetch=0,
            grid=(nb,),
            in_specs=in_specs,
            out_specs=out_specs,
        ),
        compiler_params=pltpu.CompilerParams(
            dimension_semantics=("parallel",)),
    )(e_emb, x_emb, *weight_arrays)

    logits = logits.reshape(B_pad, S)[:B]
    attw = attw[:B]
    return logits, attw   # (B, S), (B, S, S)


def sakt_reference(e_emb, x_emb, params, num_heads):
    """Pure-JAX reference, same math as the PyTorch forward (eval mode)."""
    E = e_emb.shape[-1]
    dh = E // num_heads
    S = e_emb.shape[1]

    def one(e, x):
        q = e @ params["wq"].T + params["bq"][0]
        k = x @ params["wk"].T + params["bk"][0]
        v = x @ params["wv"].T + params["bv"][0]
        row = jnp.arange(S)[:, None]
        col = jnp.arange(S)[None, :]
        masked = col > row
        attn_sum = jnp.zeros((S, S), jnp.float32)
        outs = []
        for h in range(num_heads):
            qh = q[:, h * dh:(h + 1) * dh] / jnp.sqrt(jnp.float32(dh))
            kh = k[:, h * dh:(h + 1) * dh]
            vh = v[:, h * dh:(h + 1) * dh]
            s = jnp.where(masked, -1e30, qh @ kh.T)
            p = jax.nn.softmax(s, axis=-1)
            attn_sum = attn_sum + p
            outs.append(p @ vh)
        attw = attn_sum / num_heads
        att = jnp.concatenate(outs, axis=-1) @ params["wo"].T + params["bo"][0]

        def ln(y):
            mu = jnp.mean(y, -1, keepdims=True)
            var = jnp.mean((y - mu) ** 2, -1, keepdims=True)
            return (y - mu) / jnp.sqrt(var + 1e-5) * params["ln_g"][0] + params["ln_b"][0]

        h1 = ln(att + e)
        f = jnp.maximum(h1 @ params["w1"].T + params["b1"][0], 0.0)
        f = f @ params["w2"].T + params["b2"][0]
        h2 = ln(f + h1)
        logits = h2 @ params["wp"].T + params["bp"][0]
        return logits[:, 0], attw

    return jax.vmap(one)(e_emb, x_emb)


if __name__ == "__main__":
    # Small shapes consistent with the module (embed_dim divisible by num_heads).
    B, S, E, H = 4, 8, 32, 4
    N_SKILL = 50
    MAX_SEQ = 16

    key = jax.random.PRNGKey(0)
    keys = jax.random.split(key, 24)

    def nrm(k, shape, scale=0.05):
        return (jax.random.normal(k, shape, dtype=jnp.float32) * scale)

    # Embedding tables (nn.Embedding equivalents)
    embedding = nrm(keys[0], (2 * N_SKILL + 1, E), 1.0)
    pos_embedding = nrm(keys[1], (MAX_SEQ - 1, E), 1.0)
    e_embedding = nrm(keys[2], (N_SKILL + 1, E), 1.0)

    params = {
        # nn.MultiheadAttention in-projection split into q/k/v, plus out-proj
        "wq": nrm(keys[3], (E, E)), "bq": nrm(keys[4], (1, E)),
        "wk": nrm(keys[5], (E, E)), "bk": nrm(keys[6], (1, E)),
        "wv": nrm(keys[7], (E, E)), "bv": nrm(keys[8], (1, E)),
        "wo": nrm(keys[9], (E, E)), "bo": nrm(keys[10], (1, E)),
        # shared LayerNorm (used twice, as in the PyTorch module)
        "ln_g": jnp.ones((1, E), jnp.float32),
        "ln_b": nrm(keys[11], (1, E)),
        # FFN
        "w1": nrm(keys[12], (E, E)), "b1": nrm(keys[13], (1, E)),
        "w2": nrm(keys[14], (E, E)), "b2": nrm(keys[15], (1, E)),
        # pred head: Linear(E, 1)
        "wp": nrm(keys[16], (1, E)), "bp": nrm(keys[17], (1, 1)),
    }

    # Integer inputs: x in [0, 2*n_skill], question_ids in [0, n_skill]
    x_ids = jax.random.randint(keys[18], (B, S), 0, 2 * N_SKILL + 1)
    q_ids = jax.random.randint(keys[19], (B, S), 0, N_SKILL + 1)

    # Embedding lookups + positional add (glue in plain JAX; gathers not hot path)
    pos_ids = jnp.arange(S)
    x_emb = embedding[x_ids] + pos_embedding[pos_ids][None, :, :]   # (B, S, E)
    e_emb = e_embedding[q_ids]                                      # (B, S, E)

    logits, attw = sakt_pallas(e_emb, x_emb, params, H, batch_tile=2)
    logits = jax.block_until_ready(logits)
    attw = jax.block_until_ready(attw)

    ref_logits, ref_attw = sakt_reference(e_emb, x_emb, params, H)
    assert logits.shape == (B, S) and attw.shape == (B, S, S)
    assert jnp.allclose(logits, ref_logits, atol=2e-3, rtol=2e-3)
    assert jnp.allclose(attw, ref_attw, atol=2e-3, rtol=2e-3)

    print("KERNEL_OK")
</pallas_src>

<mosaic_0001>
module attributes {stable_mosaic.version = 11 : i64} {
  func.func @sakt_kernel(%arg0: i32, %arg1: memref<2x8x32xf32, #tpu.memory_space<vmem>>, %arg2: memref<2x8x32xf32, #tpu.memory_space<vmem>>, %arg3: memref<32x32xf32, #tpu.memory_space<vmem>>, %arg4: memref<1x32xf32, #tpu.memory_space<vmem>>, %arg5: memref<32x32xf32, #tpu.memory_space<vmem>>, %arg6: memref<1x32xf32, #tpu.memory_space<vmem>>, %arg7: memref<32x32xf32, #tpu.memory_space<vmem>>, %arg8: memref<1x32xf32, #tpu.memory_space<vmem>>, %arg9: memref<32x32xf32, #tpu.memory_space<vmem>>, %arg10: memref<1x32xf32, #tpu.memory_space<vmem>>, %arg11: memref<1x32xf32, #tpu.memory_space<vmem>>, %arg12: memref<1x32xf32, #tpu.memory_space<vmem>>, %arg13: memref<32x32xf32, #tpu.memory_space<vmem>>, %arg14: memref<1x32xf32, #tpu.memory_space<vmem>>, %arg15: memref<32x32xf32, #tpu.memory_space<vmem>>, %arg16: memref<1x32xf32, #tpu.memory_space<vmem>>, %arg17: memref<1x32xf32, #tpu.memory_space<vmem>>, %arg18: memref<1x1xf32, #tpu.memory_space<vmem>>, %arg19: memref<1x2x8xf32, #tpu.memory_space<vmem>>, %arg20: memref<2x8x8xf32, #tpu.memory_space<vmem>>) attributes {dimension_semantics = [#tpu.dimension_semantics<parallel>], iteration_bounds = array<i64: 2>, scalar_prefetch = 0 : i64, scratch_operands = 0 : i64, tpu.core_type = #tpu.core_type<tc>, window_params = [{transform_indices = @transform_0, window_bounds = array<i64: 2, 8, 32>}, {transform_indices = @transform_1, window_bounds = array<i64: 2, 8, 32>}, {pipeline_mode = #tpu.pipeline_mode<synchronous>, transform_indices = @transform_2, window_bounds = array<i64: 32, 32>}, {pipeline_mode = #tpu.pipeline_mode<synchronous>, transform_indices = @transform_3, window_bounds = array<i64: 1, 32>}, {pipeline_mode = #tpu.pipeline_mode<synchronous>, transform_indices = @transform_4, window_bounds = array<i64: 32, 32>}, {pipeline_mode = #tpu.pipeline_mode<synchronous>, transform_indices = @transform_5, window_bounds = array<i64: 1, 32>}, {pipeline_mode = #tpu.pipeline_mode<synchronous>, transform_indices = @transform_6, window_bounds = array<i64: 32, 32>}, {pipeline_mode = #tpu.pipeline_mode<synchronous>, transform_indices = @transform_7, window_bounds = array<i64: 1, 32>}, {pipeline_mode = #tpu.pipeline_mode<synchronous>, transform_indices = @transform_8, window_bounds = array<i64: 32, 32>}, {pipeline_mode = #tpu.pipeline_mode<synchronous>, transform_indices = @transform_9, window_bounds = array<i64: 1, 32>}, {pipeline_mode = #tpu.pipeline_mode<synchronous>, transform_indices = @transform_10, window_bounds = array<i64: 1, 32>}, {pipeline_mode = #tpu.pipeline_mode<synchronous>, transform_indices = @transform_11, window_bounds = array<i64: 1, 32>}, {pipeline_mode = #tpu.pipeline_mode<synchronous>, transform_indices = @transform_12, window_bounds = array<i64: 32, 32>}, {pipeline_mode = #tpu.pipeline_mode<synchronous>, transform_indices = @transform_13, window_bounds = array<i64: 1, 32>}, {pipeline_mode = #tpu.pipeline_mode<synchronous>, transform_indices = @transform_14, window_bounds = array<i64: 32, 32>}, {pipeline_mode = #tpu.pipeline_mode<synchronous>, transform_indices = @transform_15, window_bounds = array<i64: 1, 32>}, {pipeline_mode = #tpu.pipeline_mode<synchronous>, transform_indices = @transform_16, window_bounds = array<i64: 1, 32>}, {pipeline_mode = #tpu.pipeline_mode<synchronous>, transform_indices = @transform_17, window_bounds = array<i64: 1, 1>}, {transform_indices = @transform_18, window_bounds = array<i64: 1, 2, 8>}, {transform_indices = @transform_19, window_bounds = array<i64: 2, 8, 8>}]} {
    %c0 = arith.constant 0 : index
    %c0_0 = arith.constant 0 : index
    %c0_1 = arith.constant 0 : index
    %0 = vector.load %arg1[%c0, %c0_0, %c0_1] : memref<2x8x32xf32, #tpu.memory_space<vmem>>, vector<2x8x32xf32>
    %1 = vector.shape_cast %0 : vector<2x8x32xf32> to vector<16x32xf32>
    %c0_2 = arith.constant 0 : index
    %c0_3 = arith.constant 0 : index
    %c0_4 = arith.constant 0 : index
    %2 = vector.load %arg2[%c0_2, %c0_3, %c0_4] : memref<2x8x32xf32, #tpu.memory_space<vmem>>, vector<2x8x32xf32>
    %3 = vector.shape_cast %2 : vector<2x8x32xf32> to vector<16x32xf32>
    %c0_5 = arith.constant 0 : index
    %c0_6 = arith.constant 0 : index
    %4 = vector.load %arg3[%c0_5, %c0_6] : memref<32x32xf32, #tpu.memory_space<vmem>>, vector<32x32xf32>
    %cst = arith.constant dense<0.000000e+00> : vector<16x32xf32>
    %5 = tpu.matmul %1, %4, %cst {dimension_numbers = #tpu.dot_dimension_numbers<[1], [0], [0], [1], [0, 0, 1, 1], [], []>} : vector<16x32xf32>, vector<32x32xf32>, vector<16x32xf32> -> vector<16x32xf32>
    %c0_7 = arith.constant 0 : index
    %c0_8 = arith.constant 0 : index
    %6 = vector.load %arg4[%c0_7, %c0_8] : memref<1x32xf32, #tpu.memory_space<vmem>>, vector<1x32xf32>
    %7 = vector.broadcast %6 : vector<1x32xf32> to vector<16x32xf32>
    %8 = arith.addf %5, %7 : vector<16x32xf32>
    %c0_9 = arith.constant 0 : index
    %c0_10 = arith.constant 0 : index
    %9 = vector.load %arg5[%c0_9, %c0_10] : memref<32x32xf32, #tpu.memory_space<vmem>>, vector<32x32xf32>
    %cst_11 = arith.constant dense<0.000000e+00> : vector<16x32xf32>
    %10 = tpu.matmul %3, %9, %cst_11 {dimension_numbers = #tpu.dot_dimension_numbers<[1], [0], [0], [1], [0, 0, 1, 1], [], []>} : vector<16x32xf32>, vector<32x32xf32>, vector<16x32xf32> -> vector<16x32xf32>
    %c0_12 = arith.constant 0 : index
    %c0_13 = arith.constant 0 : index
    %11 = vector.load %arg6[%c0_12, %c0_13] : memref<1x32xf32, #tpu.memory_space<vmem>>, vector<1x32xf32>
    %12 = vector.broadcast %11 : vector<1x32xf32> to vector<16x32xf32>
    %13 = arith.addf %10, %12 : vector<16x32xf32>
    %c0_14 = arith.constant 0 : index
    %c0_15 = arith.constant 0 : index
    %14 = vector.load %arg7[%c0_14, %c0_15] : memref<32x32xf32, #tpu.memory_space<vmem>>, vector<32x32xf32>
    %cst_16 = arith.constant dense<0.000000e+00> : vector<16x32xf32>
    %15 = tpu.matmul %3, %14, %cst_16 {dimension_numbers = #tpu.dot_dimension_numbers<[1], [0], [0], [1], [0, 0, 1, 1], [], []>} : vector<16x32xf32>, vector<32x32xf32>, vector<16x32xf32> -> vector<16x32xf32>
    %c0_17 = arith.constant 0 : index
    %c0_18 = arith.constant 0 : index
    %16 = vector.load %arg8[%c0_17, %c0_18] : memref<1x32xf32, #tpu.memory_space<vmem>>, vector<1x32xf32>
    %17 = vector.broadcast %16 : vector<1x32xf32> to vector<16x32xf32>
    %18 = arith.addf %15, %17 : vector<16x32xf32>
    %19 = tpu.iota {dimensions = array<i32: 0>} : vector<8x8xi32>
    %20 = tpu.iota {dimensions = array<i32: 1>} : vector<8x8xi32>
    %21 = arith.cmpi sgt, %20, %19 : vector<8x8xi32>
    %22 = vector.shape_cast %21 : vector<8x8xi1> to vector<1x8x8xi1>
    %cst_19 = arith.constant 0.000000e+00 : f32
    %23 = vector.broadcast %cst_19 : f32 to vector<2x8x8xf32>
    %cst_20 = arith.constant 0.000000e+00 : f32
    %24 = vector.broadcast %cst_20 : f32 to vector<16x32xf32>
    %25 = vector.extract_strided_slice %8 {offsets = [0, 0], sizes = [16, 8], strides = [1, 1]} : vector<16x32xf32> to vector<16x8xf32>
    %cst_21 = arith.constant 0.353553385 : f32
    %26 = vector.broadcast %cst_21 : f32 to vector<16x8xf32>
    %27 = arith.mulf %25, %26 : vector<16x8xf32>
    %28 = vector.shape_cast %27 : vector<16x8xf32> to vector<2x8x8xf32>
    %29 = vector.extract_strided_slice %13 {offsets = [0, 0], sizes = [16, 8], strides = [1, 1]} : vector<16x32xf32> to vector<16x8xf32>
    %30 = vector.shape_cast %29 : vector<16x8xf32> to vector<2x8x8xf32>
    %31 = vector.extract_strided_slice %18 {offsets = [0, 0], sizes = [16, 8], strides = [1, 1]} : vector<16x32xf32> to vector<16x8xf32>
    %32 = vector.shape_cast %31 : vector<16x8xf32> to vector<2x8x8xf32>
    "tpu.trace_start"() <{level = 10 : i32, message = "bqd,bkd->bqk"}> : () -> ()
    %cst_22 = arith.constant dense<0.000000e+00> : vector<2x8x8xf32>
    %33 = tpu.matmul %28, %30, %cst_22 {dimension_numbers = #tpu.dot_dimension_numbers<[2], [2], [1], [1], [0, 0, 0, 1, 1, 1], [0], [0]>} : vector<2x8x8xf32>, vector<2x8x8xf32>, vector<2x8x8xf32> -> vector<2x8x8xf32>
    %cst_23 = arith.constant -1.000000e+30 : f32
    "tpu.trace_stop"() : () -> ()
    %34 = vector.shape_cast %22 : vector<1x8x8xi1> to vector<1x8x8xi1>
    %35 = vector.broadcast %34 : vector<1x8x8xi1> to vector<2x8x8xi1>
    %36 = vector.broadcast %cst_23 : f32 to vector<2x8x8xf32>
    %37 = arith.select %35, %36, %33 : vector<2x8x8xi1>, vector<2x8x8xf32>
    %cst_24 = arith.constant dense<0xFF800000> : vector<2x8xf32>
    %38 = vector.multi_reduction <maximumf>, %37, %cst_24 [2] : vector<2x8x8xf32> to vector<2x8xf32>
    %39 = vector.shape_cast %38 : vector<2x8xf32> to vector<2x8x1xf32>
    %40 = vector.broadcast %39 : vector<2x8x1xf32> to vector<2x8x8xf32>
    %41 = arith.subf %37, %40 : vector<2x8x8xf32>
    %42 = math.exp %41 : vector<2x8x8xf32>
    %cst_25 = arith.constant dense<0.000000e+00> : vector<2x8xf32>
    %43 = vector.multi_reduction <add>, %42, %cst_25 [2] : vector<2x8x8xf32> to vector<2x8xf32>
    %44 = vector.shape_cast %43 : vector<2x8xf32> to vector<2x8x1xf32>
    %45 = tpu.reciprocal %44 {approx = true} : vector<2x8x1xf32> -> vector<2x8x1xf32>
    %46 = vector.broadcast %45 : vector<2x8x1xf32> to vector<2x8x8xf32>
    %47 = arith.mulf %42, %46 : vector<2x8x8xf32>
    %48 = arith.addf %23, %47 : vector<2x8x8xf32>
    "tpu.trace_start"() <{level = 10 : i32, message = "bqk,bkd->bqd"}> : () -> ()
    %cst_26 = arith.constant dense<0.000000e+00> : vector<2x8x8xf32>
    %49 = tpu.matmul %47, %32, %cst_26 {dimension_numbers = #tpu.dot_dimension_numbers<[2], [1], [1], [2], [0, 0, 0, 1, 1, 2], [0], [0]>} : vector<2x8x8xf32>, vector<2x8x8xf32>, vector<2x8x8xf32> -> vector<2x8x8xf32>
    "tpu.trace_stop"() : () -> ()
    %50 = vector.shape_cast %49 : vector<2x8x8xf32> to vector<16x8xf32>
    %c0_27 = arith.constant 0 : index
    %c0_28 = arith.constant 0 : index
    %51 = vector.load %arg9[%c0_27, %c0_28] : memref<32x32xf32, #tpu.memory_space<vmem>>, vector<8x32xf32>
    %cst_29 = arith.constant dense<0.000000e+00> : vector<16x32xf32>
    %52 = tpu.matmul %50, %51, %cst_29 {dimension_numbers = #tpu.dot_dimension_numbers<[1], [0], [0], [1], [0, 0, 1, 1], [], []>} : vector<16x8xf32>, vector<8x32xf32>, vector<16x32xf32> -> vector<16x32xf32>
    %53 = arith.addf %24, %52 : vector<16x32xf32>
    %54 = vector.extract_strided_slice %8 {offsets = [0, 8], sizes = [16, 8], strides = [1, 1]} : vector<16x32xf32> to vector<16x8xf32>
    %cst_30 = arith.constant 0.353553385 : f32
    %55 = vector.broadcast %cst_30 : f32 to vector<16x8xf32>
    %56 = arith.mulf %54, %55 : vector<16x8xf32>
    %57 = vector.shape_cast %56 : vector<16x8xf32> to vector<2x8x8xf32>
    %58 = vector.extract_strided_slice %13 {offsets = [0, 8], sizes = [16, 8], strides = [1, 1]} : vector<16x32xf32> to vector<16x8xf32>
    %59 = vector.shape_cast %58 : vector<16x8xf32> to vector<2x8x8xf32>
    %60 = vector.extract_strided_slice %18 {offsets = [0, 8], sizes = [16, 8], strides = [1, 1]} : vector<16x32xf32> to vector<16x8xf32>
    %61 = vector.shape_cast %60 : vector<16x8xf32> to vector<2x8x8xf32>
    "tpu.trace_start"() <{level = 10 : i32, message = "bqd,bkd->bqk"}> : () -> ()
    %cst_31 = arith.constant dense<0.000000e+00> : vector<2x8x8xf32>
    %62 = tpu.matmul %57, %59, %cst_31 {dimension_numbers = #tpu.dot_dimension_numbers<[2], [2], [1], [1], [0, 0, 0, 1, 1, 1], [0], [0]>} : vector<2x8x8xf32>, vector<2x8x8xf32>, vector<2x8x8xf32> -> vector<2x8x8xf32>
    %cst_32 = arith.constant -1.000000e+30 : f32
    "tpu.trace_stop"() : () -> ()
    %63 = vector.shape_cast %22 : vector<1x8x8xi1> to vector<1x8x8xi1>
    %64 = vector.broadcast %63 : vector<1x8x8xi1> to vector<2x8x8xi1>
    %65 = vector.broadcast %cst_32 : f32 to vector<2x8x8xf32>
    %66 = arith.select %64, %65, %62 : vector<2x8x8xi1>, vector<2x8x8xf32>
    %cst_33 = arith.constant dense<0xFF800000> : vector<2x8xf32>
    %67 = vector.multi_reduction <maximumf>, %66, %cst_33 [2] : vector<2x8x8xf32> to vector<2x8xf32>
    %68 = vector.shape_cast %67 : vector<2x8xf32> to vector<2x8x1xf32>
    %69 = vector.broadcast %68 : vector<2x8x1xf32> to vector<2x8x8xf32>
    %70 = arith.subf %66, %69 : vector<2x8x8xf32>
    %71 = math.exp %70 : vector<2x8x8xf32>
    %cst_34 = arith.constant dense<0.000000e+00> : vector<2x8xf32>
    %72 = vector.multi_reduction <add>, %71, %cst_34 [2] : vector<2x8x8xf32> to vector<2x8xf32>
    %73 = vector.shape_cast %72 : vector<2x8xf32> to vector<2x8x1xf32>
    %74 = tpu.reciprocal %73 {approx = true} : vector<2x8x1xf32> -> vector<2x8x1xf32>
    %75 = vector.broadcast %74 : vector<2x8x1xf32> to vector<2x8x8xf32>
    %76 = arith.mulf %71, %75 : vector<2x8x8xf32>
    %77 = arith.addf %48, %76 : vector<2x8x8xf32>
    "tpu.trace_start"() <{level = 10 : i32, message = "bqk,bkd->bqd"}> : () -> ()
    %cst_35 = arith.constant dense<0.000000e+00> : vector<2x8x8xf32>
    %78 = tpu.matmul %76, %61, %cst_35 {dimension_numbers = #tpu.dot_dimension_numbers<[2], [1], [1], [2], [0, 0, 0, 1, 1, 2], [0], [0]>} : vector<2x8x8xf32>, vector<2x8x8xf32>, vector<2x8x8xf32> -> vector<2x8x8xf32>
    "tpu.trace_stop"() : () -> ()
    %79 = vector.shape_cast %78 : vector<2x8x8xf32> to vector<16x8xf32>
    %c8 = arith.constant 8 : index
    %c0_36 = arith.constant 0 : index
    %80 = vector.load %arg9[%c8, %c0_36] : memref<32x32xf32, #tpu.memory_space<vmem>>, vector<8x32xf32>
    %cst_37 = arith.constant dense<0.000000e+00> : vector<16x32xf32>
    %81 = tpu.matmul %79, %80, %cst_37 {dimension_numbers = #tpu.dot_dimension_numbers<[1], [0], [0], [1], [0, 0, 1, 1], [], []>} : vector<16x8xf32>, vector<8x32xf32>, vector<16x32xf32> -> vector<16x32xf32>
    %82 = arith.addf %53, %81 : vector<16x32xf32>
    %83 = vector.extract_strided_slice %8 {offsets = [0, 16], sizes = [16, 8], strides = [1, 1]} : vector<16x32xf32> to vector<16x8xf32>
    %cst_38 = arith.constant 0.353553385 : f32
    %84 = vector.broadcast %cst_38 : f32 to vector<16x8xf32>
    %85 = arith.mulf %83, %84 : vector<16x8xf32>
    %86 = vector.shape_cast %85 : vector<16x8xf32> to vector<2x8x8xf32>
    %87 = vector.extract_strided_slice %13 {offsets = [0, 16], sizes = [16, 8], strides = [1, 1]} : vector<16x32xf32> to vector<16x8xf32>
    %88 = vector.shape_cast %87 : vector<16x8xf32> to vector<2x8x8xf32>
    %89 = vector.extract_strided_slice %18 {offsets = [0, 16], sizes = [16, 8], strides = [1, 1]} : vector<16x32xf32> to vector<16x8xf32>
    %90 = vector.shape_cast %89 : vector<16x8xf32> to vector<2x8x8xf32>
    "tpu.trace_start"() <{level = 10 : i32, message = "bqd,bkd->bqk"}> : () -> ()
    %cst_39 = arith.constant dense<0.000000e+00> : vector<2x8x8xf32>
    %91 = tpu.matmul %86, %88, %cst_39 {dimension_numbers = #tpu.dot_dimension_numbers<[2], [2], [1], [1], [0, 0, 0, 1, 1, 1], [0], [0]>} : vector<2x8x8xf32>, vector<2x8x8xf32>, vector<2x8x8xf32> -> vector<2x8x8xf32>
    %cst_40 = arith.constant -1.000000e+30 : f32
    "tpu.trace_stop"() : () -> ()
    %92 = vector.shape_cast %22 : vector<1x8x8xi1> to vector<1x8x8xi1>
    %93 = vector.broadcast %92 : vector<1x8x8xi1> to vector<2x8x8xi1>
    %94 = vector.broadcast %cst_40 : f32 to vector<2x8x8xf32>
    %95 = arith.select %93, %94, %91 : vector<2x8x8xi1>, vector<2x8x8xf32>
    %cst_41 = arith.constant dense<0xFF800000> : vector<2x8xf32>
    %96 = vector.multi_reduction <maximumf>, %95, %cst_41 [2] : vector<2x8x8xf32> to vector<2x8xf32>
    %97 = vector.shape_cast %96 : vector<2x8xf32> to vector<2x8x1xf32>
    %98 = vector.broadcast %97 : vector<2x8x1xf32> to vector<2x8x8xf32>
    %99 = arith.subf %95, %98 : vector<2x8x8xf32>
    %100 = math.exp %99 : vector<2x8x8xf32>
    %cst_42 = arith.constant dense<0.000000e+00> : vector<2x8xf32>
    %101 = vector.multi_reduction <add>, %100, %cst_42 [2] : vector<2x8x8xf32> to vector<2x8xf32>
    %102 = vector.shape_cast %101 : vector<2x8xf32> to vector<2x8x1xf32>
    %103 = tpu.reciprocal %102 {approx = true} : vector<2x8x1xf32> -> vector<2x8x1xf32>
    %104 = vector.broadcast %103 : vector<2x8x1xf32> to vector<2x8x8xf32>
    %105 = arith.mulf %100, %104 : vector<2x8x8xf32>
    %106 = arith.addf %77, %105 : vector<2x8x8xf32>
    "tpu.trace_start"() <{level = 10 : i32, message = "bqk,bkd->bqd"}> : () -> ()
    %cst_43 = arith.constant dense<0.000000e+00> : vector<2x8x8xf32>
    %107 = tpu.matmul %105, %90, %cst_43 {dimension_numbers = #tpu.dot_dimension_numbers<[2], [1], [1], [2], [0, 0, 0, 1, 1, 2], [0], [0]>} : vector<2x8x8xf32>, vector<2x8x8xf32>, vector<2x8x8xf32> -> vector<2x8x8xf32>
    "tpu.trace_stop"() : () -> ()
    %108 = vector.shape_cast %107 : vector<2x8x8xf32> to vector<16x8xf32>
    %c16 = arith.constant 16 : index
    %c0_44 = arith.constant 0 : index
    %109 = vector.load %arg9[%c16, %c0_44] : memref<32x32xf32, #tpu.memory_space<vmem>>, vector<8x32xf32>
    %cst_45 = arith.constant dense<0.000000e+00> : vector<16x32xf32>
    %110 = tpu.matmul %108, %109, %cst_45 {dimension_numbers = #tpu.dot_dimension_numbers<[1], [0], [0], [1], [0, 0, 1, 1], [], []>} : vector<16x8xf32>, vector<8x32xf32>, vector<16x32xf32> -> vector<16x32xf32>
    %111 = arith.addf %82, %110 : vector<16x32xf32>
    %112 = vector.extract_strided_slice %8 {offsets = [0, 24], sizes = [16, 8], strides = [1, 1]} : vector<16x32xf32> to vector<16x8xf32>
    %cst_46 = arith.constant 0.353553385 : f32
    %113 = vector.broadcast %cst_46 : f32 to vector<16x8xf32>
    %114 = arith.mulf %112, %113 : vector<16x8xf32>
    %115 = vector.shape_cast %114 : vector<16x8xf32> to vector<2x8x8xf32>
    %116 = vector.extract_strided_slice %13 {offsets = [0, 24], sizes = [16, 8], strides = [1, 1]} : vector<16x32xf32> to vector<16x8xf32>
    %117 = vector.shape_cast %116 : vector<16x8xf32> to vector<2x8x8xf32>
    %118 = vector.extract_strided_slice %18 {offsets = [0, 24], sizes = [16, 8], strides = [1, 1]} : vector<16x32xf32> to vector<16x8xf32>
    %119 = vector.shape_cast %118 : vector<16x8xf32> to vector<2x8x8xf32>
    "tpu.trace_start"() <{level = 10 : i32, message = "bqd,bkd->bqk"}> : () -> ()
    %cst_47 = arith.constant dense<0.000000e+00> : vector<2x8x8xf32>
    %120 = tpu.matmul %115, %117, %cst_47 {dimension_numbers = #tpu.dot_dimension_numbers<[2], [2], [1], [1], [0, 0, 0, 1, 1, 1], [0], [0]>} : vector<2x8x8xf32>, vector<2x8x8xf32>, vector<2x8x8xf32> -> vector<2x8x8xf32>
    %cst_48 = arith.constant -1.000000e+30 : f32
    "tpu.trace_stop"() : () -> ()
    %121 = vector.shape_cast %22 : vector<1x8x8xi1> to vector<1x8x8xi1>
    %122 = vector.broadcast %121 : vector<1x8x8xi1> to vector<2x8x8xi1>
    %123 = vector.broadcast %cst_48 : f32 to vector<2x8x8xf32>
    %124 = arith.select %122, %123, %120 : vector<2x8x8xi1>, vector<2x8x8xf32>
    %cst_49 = arith.constant dense<0xFF800000> : vector<2x8xf32>
    %125 = vector.multi_reduction <maximumf>, %124, %cst_49 [2] : vector<2x8x8xf32> to vector<2x8xf32>
    %126 = vector.shape_cast %125 : vector<2x8xf32> to vector<2x8x1xf32>
    %127 = vector.broadcast %126 : vector<2x8x1xf32> to vector<2x8x8xf32>
    %128 = arith.subf %124, %127 : vector<2x8x8xf32>
    %129 = math.exp %128 : vector<2x8x8xf32>
    %cst_50 = arith.constant dense<0.000000e+00> : vector<2x8xf32>
    %130 = vector.multi_reduction <add>, %129, %cst_50 [2] : vector<2x8x8xf32> to vector<2x8xf32>
    %131 = vector.shape_cast %130 : vector<2x8xf32> to vector<2x8x1xf32>
    %132 = tpu.reciprocal %131 {approx = true} : vector<2x8x1xf32> -> vector<2x8x1xf32>
    %133 = vector.broadcast %132 : vector<2x8x1xf32> to vector<2x8x8xf32>
    %134 = arith.mulf %129, %133 : vector<2x8x8xf32>
    %135 = arith.addf %106, %134 : vector<2x8x8xf32>
    "tpu.trace_start"() <{level = 10 : i32, message = "bqk,bkd->bqd"}> : () -> ()
    %cst_51 = arith.constant dense<0.000000e+00> : vector<2x8x8xf32>
    %136 = tpu.matmul %134, %119, %cst_51 {dimension_numbers = #tpu.dot_dimension_numbers<[2], [1], [1], [2], [0, 0, 0, 1, 1, 2], [0], [0]>} : vector<2x8x8xf32>, vector<2x8x8xf32>, vector<2x8x8xf32> -> vector<2x8x8xf32>
    "tpu.trace_stop"() : () -> ()
    %137 = vector.shape_cast %136 : vector<2x8x8xf32> to vector<16x8xf32>
    %c24 = arith.constant 24 : index
    %c0_52 = arith.constant 0 : index
    %138 = vector.load %arg9[%c24, %c0_52] : memref<32x32xf32, #tpu.memory_space<vmem>>, vector<8x32xf32>
    %cst_53 = arith.constant dense<0.000000e+00> : vector<16x32xf32>
    %139 = tpu.matmul %137, %138, %cst_53 {dimension_numbers = #tpu.dot_dimension_numbers<[1], [0], [0], [1], [0, 0, 1, 1], [], []>} : vector<16x8xf32>, vector<8x32xf32>, vector<16x32xf32> -> vector<16x32xf32>
    %140 = arith.addf %111, %139 : vector<16x32xf32>
    %cst_54 = arith.constant 2.500000e-01 : f32
    %141 = vector.broadcast %cst_54 : f32 to vector<2x8x8xf32>
    %142 = arith.mulf %135, %141 : vector<2x8x8xf32>
    %c0_55 = arith.constant 0 : index
    %c0_56 = arith.constant 0 : index
    %c0_57 = arith.constant 0 : index
    %143 = vector.load %arg20[%c0_55, %c0_56, %c0_57] : memref<2x8x8xf32, #tpu.memory_space<vmem>>, vector<2x8x8xf32>
    tpu.vector_store %arg20[%c0_55, %c0_56, %c0_57], %142 {strides = array<i32>} : memref<2x8x8xf32, #tpu.memory_space<vmem>>, vector<2x8x8xf32>,
    %c0_58 = arith.constant 0 : index
    %c0_59 = arith.constant 0 : index
    %144 = vector.load %arg10[%c0_58, %c0_59] : memref<1x32xf32, #tpu.memory_space<vmem>>, vector<1x32xf32>
    %145 = vector.broadcast %144 : vector<1x32xf32> to vector<16x32xf32>
    %146 = arith.addf %140, %145 : vector<16x32xf32>
    %147 = arith.addf %146, %1 : vector<16x32xf32>
    %cst_60 = arith.constant dense<0.000000e+00> : vector<16xf32>
    %148 = vector.multi_reduction <add>, %147, %cst_60 [1] : vector<16x32xf32> to vector<16xf32>
    %149 = vector.shape_cast %148 : vector<16xf32> to vector<16x1xf32>
    %cst_61 = arith.constant 3.200000e+01 : f32
    %150 = vector.broadcast %cst_61 : f32 to vector<16x1xf32>
    %151 = arith.divf %149, %150 : vector<16x1xf32>
    %152 = vector.broadcast %151 : vector<16x1xf32> to vector<16x32xf32>
    %153 = arith.subf %147, %152 : vector<16x32xf32>
    %154 = arith.mulf %153, %153 : vector<16x32xf32>
    %cst_62 = arith.constant dense<0.000000e+00> : vector<16xf32>
    %155 = vector.multi_reduction <add>, %154, %cst_62 [1] : vector<16x32xf32> to vector<16xf32>
    %156 = vector.shape_cast %155 : vector<16xf32> to vector<16x1xf32>
    %cst_63 = arith.constant 3.200000e+01 : f32
    %157 = vector.broadcast %cst_63 : f32 to vector<16x1xf32>
    %158 = arith.divf %156, %157 : vector<16x1xf32>
    %159 = vector.broadcast %151 : vector<16x1xf32> to vector<16x32xf32>
    %160 = arith.subf %147, %159 : vector<16x32xf32>
    %cst_64 = arith.constant 9.99999974E-6 : f32
    %161 = vector.broadcast %cst_64 : f32 to vector<16x1xf32>
    %162 = arith.addf %158, %161 : vector<16x1xf32>
    %163 = math.rsqrt %162 : vector<16x1xf32>
    %164 = vector.broadcast %163 : vector<16x1xf32> to vector<16x32xf32>
    %165 = arith.mulf %160, %164 : vector<16x32xf32>
    %c0_65 = arith.constant 0 : index
    %c0_66 = arith.constant 0 : index
    %166 = vector.load %arg11[%c0_65, %c0_66] : memref<1x32xf32, #tpu.memory_space<vmem>>, vector<1x32xf32>
    %167 = vector.broadcast %166 : vector<1x32xf32> to vector<16x32xf32>
    %168 = arith.mulf %165, %167 : vector<16x32xf32>
    %c0_67 = arith.constant 0 : index
    %c0_68 = arith.constant 0 : index
    %169 = vector.load %arg12[%c0_67, %c0_68] : memref<1x32xf32, #tpu.memory_space<vmem>>, vector<1x32xf32>
    %170 = vector.broadcast %169 : vector<1x32xf32> to vector<16x32xf32>
    %171 = arith.addf %168, %170 : vector<16x32xf32>
    %c0_69 = arith.constant 0 : index
    %c0_70 = arith.constant 0 : index
    %172 = vector.load %arg13[%c0_69, %c0_70] : memref<32x32xf32, #tpu.memory_space<vmem>>, vector<32x32xf32>
    %cst_71 = arith.constant dense<0.000000e+00> : vector<16x32xf32>
    %173 = tpu.matmul %171, %172, %cst_71 {dimension_numbers = #tpu.dot_dimension_numbers<[1], [0], [0], [1], [0, 0, 1, 1], [], []>} : vector<16x32xf32>, vector<32x32xf32>, vector<16x32xf32> -> vector<16x32xf32>
    %c0_72 = arith.constant 0 : index
    %c0_73 = arith.constant 0 : index
    %174 = vector.load %arg14[%c0_72, %c0_73] : memref<1x32xf32, #tpu.memory_space<vmem>>, vector<1x32xf32>
    %175 = vector.broadcast %174 : vector<1x32xf32> to vector<16x32xf32>
    %176 = arith.addf %173, %175 : vector<16x32xf32>
    %cst_74 = arith.constant 0.000000e+00 : f32
    %177 = vector.broadcast %cst_74 : f32 to vector<16x32xf32>
    %178 = arith.maximumf %176, %177 : vector<16x32xf32>
    %c0_75 = arith.constant 0 : index
    %c0_76 = arith.constant 0 : index
    %179 = vector.load %arg15[%c0_75, %c0_76] : memref<32x32xf32, #tpu.memory_space<vmem>>, vector<32x32xf32>
    %cst_77 = arith.constant dense<0.000000e+00> : vector<16x32xf32>
    %180 = tpu.matmul %178, %179, %cst_77 {dimension_numbers = #tpu.dot_dimension_numbers<[1], [0], [0], [1], [0, 0, 1, 1], [], []>} : vector<16x32xf32>, vector<32x32xf32>, vector<16x32xf32> -> vector<16x32xf32>
    %c0_78 = arith.constant 0 : index
    %c0_79 = arith.constant 0 : index
    %181 = vector.load %arg16[%c0_78, %c0_79] : memref<1x32xf32, #tpu.memory_space<vmem>>, vector<1x32xf32>
    %182 = vector.broadcast %181 : vector<1x32xf32> to vector<16x32xf32>
    %183 = arith.addf %180, %182 : vector<16x32xf32>
    %184 = arith.addf %183, %171 : vector<16x32xf32>
    %cst_80 = arith.constant dense<0.000000e+00> : vector<16xf32>
    %185 = vector.multi_reduction <add>, %184, %cst_80 [1] : vector<16x32xf32> to vector<16xf32>
    %186 = vector.shape_cast %185 : vector<16xf32> to vector<16x1xf32>
    %cst_81 = arith.constant 3.200000e+01 : f32
    %187 = vector.broadcast %cst_81 : f32 to vector<16x1xf32>
    %188 = arith.divf %186, %187 : vector<16x1xf32>
    %189 = vector.broadcast %188 : vector<16x1xf32> to vector<16x32xf32>
    %190 = arith.subf %184, %189 : vector<16x32xf32>
    %191 = arith.mulf %190, %190 : vector<16x32xf32>
    %cst_82 = arith.constant dense<0.000000e+00> : vector<16xf32>
    %192 = vector.multi_reduction <add>, %191, %cst_82 [1] : vector<16x32xf32> to vector<16xf32>
    %193 = vector.shape_cast %192 : vector<16xf32> to vector<16x1xf32>
    %cst_83 = arith.constant 3.200000e+01 : f32
    %194 = vector.broadcast %cst_83 : f32 to vector<16x1xf32>
    %195 = arith.divf %193, %194 : vector<16x1xf32>
    %196 = vector.broadcast %188 : vector<16x1xf32> to vector<16x32xf32>
    %197 = arith.subf %184, %196 : vector<16x32xf32>
    %cst_84 = arith.constant 9.99999974E-6 : f32
    %198 = vector.broadcast %cst_84 : f32 to vector<16x1xf32>
    %199 = arith.addf %195, %198 : vector<16x1xf32>
    %200 = math.rsqrt %199 : vector<16x1xf32>
    %201 = vector.broadcast %200 : vector<16x1xf32> to vector<16x32xf32>
    %202 = arith.mulf %197, %201 : vector<16x32xf32>
    %c0_85 = arith.constant 0 : index
    %c0_86 = arith.constant 0 : index
    %203 = vector.load %arg11[%c0_85, %c0_86] : memref<1x32xf32, #tpu.memory_space<vmem>>, vector<1x32xf32>
    %204 = vector.broadcast %203 : vector<1x32xf32> to vector<16x32xf32>
    %205 = arith.mulf %202, %204 : vector<16x32xf32>
    %c0_87 = arith.constant 0 : index
    %c0_88 = arith.constant 0 : index
    %206 = vector.load %arg12[%c0_87, %c0_88] : memref<1x32xf32, #tpu.memory_space<vmem>>, vector<1x32xf32>
    %207 = vector.broadcast %206 : vector<1x32xf32> to vector<16x32xf32>
    %208 = arith.addf %205, %207 : vector<16x32xf32>
    %209 = vector.shape_cast %208 : vector<16x32xf32> to vector<2x8x32xf32>
    %c0_89 = arith.constant 0 : index
    %c0_90 = arith.constant 0 : index
    %210 = vector.load %arg17[%c0_89, %c0_90] : memref<1x32xf32, #tpu.memory_space<vmem>>, vector<1x32xf32>
    %211 = vector.shape_cast %210 : vector<1x32xf32> to vector<1x1x32xf32>
    %212 = vector.broadcast %211 : vector<1x1x32xf32> to vector<2x8x32xf32>
    %213 = arith.mulf %209, %212 : vector<2x8x32xf32>
    %cst_91 = arith.constant dense<0.000000e+00> : vector<2x8xf32>
    %214 = vector.multi_reduction <add>, %213, %cst_91 [2] : vector<2x8x32xf32> to vector<2x8xf32>
    %c0_92 = arith.constant 0 : index
    %c0_93 = arith.constant 0 : index
    %215 = vector.load %arg18[%c0_92, %c0_93] : memref<1x1xf32, #tpu.memory_space<vmem>>, vector<1x1xf32>
    %216 = vector.broadcast %215 : vector<1x1xf32> to vector<2x8xf32>
    %217 = arith.addf %214, %216 : vector<2x8xf32>
    %c0_94 = arith.constant 0 : index
    %c0_95 = arith.constant 0 : index
    %c0_96 = arith.constant 0 : index
    %218 = vector.load %arg19[%c0_94, %c0_95, %c0_96] : memref<1x2x8xf32, #tpu.memory_space<vmem>>, vector<1x2x8xf32>
    %219 = vector.shape_cast %218 : vector<1x2x8xf32> to vector<2x8xf32>
    %220 = vector.shape_cast %217 : vector<2x8xf32> to vector<1x2x8xf32>
    tpu.vector_store %arg19[%c0_94, %c0_95, %c0_96], %220 {strides = array<i32>} : memref<1x2x8xf32, #tpu.memory_space<vmem>>, vector<1x2x8xf32>,
    return
  }
  func.func @transform_0(%arg0: i32) -> (i32, i32, i32) {
    %c0_i32 = arith.constant 0 : i32
    %c0_i32_0 = arith.constant 0 : i32
    %c0_i32_1 = arith.constant 0 : i32
    return %arg0, %c0_i32, %c0_i32_0 : i32, i32, i32
  }
  func.func @transform_1(%arg0: i32) -> (i32, i32, i32) {
    %c0_i32 = arith.constant 0 : i32
    %c0_i32_0 = arith.constant 0 : i32
    %c0_i32_1 = arith.constant 0 : i32
    return %arg0, %c0_i32, %c0_i32_0 : i32, i32, i32
  }
  func.func @transform_2(%arg0: i32) -> (i32, i32) {
    %c0_i32 = arith.constant 0 : i32
    %c0_i32_0 = arith.constant 0 : i32
    %c0_i32_1 = arith.constant 0 : i32
    return %c0_i32, %c0_i32_0 : i32, i32
  }
  func.func @transform_3(%arg0: i32) -> (i32, i32) {
    %c0_i32 = arith.constant 0 : i32
    %c0_i32_0 = arith.constant 0 : i32
    %c0_i32_1 = arith.constant 0 : i32
    return %c0_i32, %c0_i32_0 : i32, i32
  }
  func.func @transform_4(%arg0: i32) -> (i32, i32) {
    %c0_i32 = arith.constant 0 : i32
    %c0_i32_0 = arith.constant 0 : i32
    %c0_i32_1 = arith.constant 0 : i32
    return %c0_i32, %c0_i32_0 : i32, i32
  }
  func.func @transform_5(%arg0: i32) -> (i32, i32) {
    %c0_i32 = arith.constant 0 : i32
    %c0_i32_0 = arith.constant 0 : i32
    %c0_i32_1 = arith.constant 0 : i32
    return %c0_i32, %c0_i32_0 : i32, i32
  }
  func.func @transform_6(%arg0: i32) -> (i32, i32) {
    %c0_i32 = arith.constant 0 : i32
    %c0_i32_0 = arith.constant 0 : i32
    %c0_i32_1 = arith.constant 0 : i32
    return %c0_i32, %c0_i32_0 : i32, i32
  }
  func.func @transform_7(%arg0: i32) -> (i32, i32) {
    %c0_i32 = arith.constant 0 : i32
    %c0_i32_0 = arith.constant 0 : i32
    %c0_i32_1 = arith.constant 0 : i32
    return %c0_i32, %c0_i32_0 : i32, i32
  }
  func.func @transform_8(%arg0: i32) -> (i32, i32) {
    %c0_i32 = arith.constant 0 : i32
    %c0_i32_0 = arith.constant 0 : i32
    %c0_i32_1 = arith.constant 0 : i32
    return %c0_i32, %c0_i32_0 : i32, i32
  }
  func.func @transform_9(%arg0: i32) -> (i32, i32) {
    %c0_i32 = arith.constant 0 : i32
    %c0_i32_0 = arith.constant 0 : i32
    %c0_i32_1 = arith.constant 0 : i32
    return %c0_i32, %c0_i32_0 : i32, i32
  }
  func.func @transform_10(%arg0: i32) -> (i32, i32) {
    %c0_i32 = arith.constant 0 : i32
    %c0_i32_0 = arith.constant 0 : i32
    %c0_i32_1 = arith.constant 0 : i32
    return %c0_i32, %c0_i32_0 : i32, i32
  }
  func.func @transform_11(%arg0: i32) -> (i32, i32) {
    %c0_i32 = arith.constant 0 : i32
    %c0_i32_0 = arith.constant 0 : i32
    %c0_i32_1 = arith.constant 0 : i32
    return %c0_i32, %c0_i32_0 : i32, i32
  }
  func.func @transform_12(%arg0: i32) -> (i32, i32) {
    %c0_i32 = arith.constant 0 : i32
    %c0_i32_0 = arith.constant 0 : i32
    %c0_i32_1 = arith.constant 0 : i32
    return %c0_i32, %c0_i32_0 : i32, i32
  }
  func.func @transform_13(%arg0: i32) -> (i32, i32) {
    %c0_i32 = arith.constant 0 : i32
    %c0_i32_0 = arith.constant 0 : i32
    %c0_i32_1 = arith.constant 0 : i32
    return %c0_i32, %c0_i32_0 : i32, i32
  }
  func.func @transform_14(%arg0: i32) -> (i32, i32) {
    %c0_i32 = arith.constant 0 : i32
    %c0_i32_0 = arith.constant 0 : i32
    %c0_i32_1 = arith.constant 0 : i32
    return %c0_i32, %c0_i32_0 : i32, i32
  }
  func.func @transform_15(%arg0: i32) -> (i32, i32) {
    %c0_i32 = arith.constant 0 : i32
    %c0_i32_0 = arith.constant 0 : i32
    %c0_i32_1 = arith.constant 0 : i32
    return %c0_i32, %c0_i32_0 : i32, i32
  }
  func.func @transform_16(%arg0: i32) -> (i32, i32) {
    %c0_i32 = arith.constant 0 : i32
    %c0_i32_0 = arith.constant 0 : i32
    %c0_i32_1 = arith.constant 0 : i32
    return %c0_i32, %c0_i32_0 : i32, i32
  }
  func.func @transform_17(%arg0: i32) -> (i32, i32) {
    %c0_i32 = arith.constant 0 : i32
    %c0_i32_0 = arith.constant 0 : i32
    %c0_i32_1 = arith.constant 0 : i32
    return %c0_i32, %c0_i32_0 : i32, i32
  }
  func.func @transform_18(%arg0: i32) -> (i32, i32, i32) {
    %c0_i32 = arith.constant 0 : i32
    %c0_i32_0 = arith.constant 0 : i32
    %c0_i32_1 = arith.constant 0 : i32
    return %arg0, %c0_i32, %c0_i32_0 : i32, i32, i32
  }
  func.func @transform_19(%arg0: i32) -> (i32, i32, i32) {
    %c0_i32 = arith.constant 0 : i32
    %c0_i32_0 = arith.constant 0 : i32
    %c0_i32_1 = arith.constant 0 : i32
    return %arg0, %c0_i32, %c0_i32_0 : i32, i32, i32
  }
}

</mosaic_0001>

<bundles_post_ra>
// kernel: tpu_custom_call.1
= control target key start
LH: loop header
LB: loop body
LE: loop exit
PB: predicated region body
PF: predicated region fallthrough
CT: control target
= control target key end

     0   :  { %s3244_s0 = inlined_call_operand.hbm [shape: f32[4,8,32], index: 0, kind: input, shape index: {}]   ;;  %s3245_s1 = inlined_call_operand.hbm [shape: f32[4,8,32], index: 1, kind: input, shape index: {}]   ;;  %s3246_s2 = inlined_call_operand.hbm [shape: f32[32,32], index: 2, kind: input, shape index: {}]   ;;  %s3247_s3 = inlined_call_operand.vmem [shape: f32[1,32], index: 3, kind: input, shape index: {}]   ;;  %s3248_s4 = inlined_call_operand.hbm [shape: f32[32,32], index: 4, kind: input, shape index: {}]   ;;  %s3249_s5 = inlined_call_operand.vmem [shape: f32[1,32], index: 5, kind: input, shape index: {}]   ;;  %s3250_s6 = inlined_call_operand.hbm [shape: f32[32,32], index: 6, kind: input, shape index: {}]   ;;  %s3251_s7 = inlined_call_operand.vmem [shape: f32[1,32], index: 7, kind: input, shape index: {}]   ;;  %s3252_s8 = inlined_call_operand.hbm [shape: f32[32,32], index: 8, kind: input, shape index: {}]   ;;  %s3253_s9 = inlined_call_operand.vmem [shape: f32[1,32], index: 9, kind: input, shape index: {}]   ;;  %s3254_s10 = inlined_call_operand.vmem [shape: f32[1,32], index: 10, kind: input, shape index: {}]   ;;  %s3255_s11 = inlined_call_operand.vmem [shape: f32[1,32], index: 11, kind: input, shape index: {}]   ;;  %s3256_s12 = inlined_call_operand.hbm [shape: f32[32,32], index: 12, kind: input, shape index: {}]   ;;  %s3257_s13 = inlined_call_operand.vmem [shape: f32[1,32], index: 13, kind: input, shape index: {}]   ;;  %s3258_s14 = inlined_call_operand.hbm [shape: f32[32,32], index: 14, kind: input, shape index: {}]   ;;  %s3259_s15 = inlined_call_operand.vmem [shape: f32[1,32], index: 15, kind: input, shape index: {}]   ;;  %s3260_s16 = inlined_call_operand.vmem [shape: f32[1,32], index: 16, kind: input, shape index: {}]   ;;  %s3261_s17 = inlined_call_operand.<no memory space> [shape: f32[1,1], index: 17, kind: input, shape index: {}]   ;;  %s3262_s18 = inlined_call_operand.hbm [shape: f32[2,2,8], index: 18, kind: output, shape index: {0}]   ;;  %s3263_s19 = inlined_call_operand.hbm [shape: f32[4,8,8], index: 19, kind: output, shape index: {1}]  }
   0x1   :  { %3280 = sst [smem:[#allocation34_spill]] %s3244_s0  ;;  %v25_v0 = vstv %s3261_s17 }
   0x2   :  { %3281 = sst [smem:[#allocation35_spill]] %s3245_s1  ;;  %26 = vst [vmem:[#allocation2] sm:$0x1] %v25_v0 }
   0x3   :  { %3282 = sst [smem:[#allocation36_spill]] %s3246_s2 }
   0x4   :  { %3283 = sst [smem:[#allocation37_spill]] %s3247_s3 }
   0x5   :  { %3284 = sst [smem:[#allocation38_spill]] %s3248_s4 }
   0x6   :  { %3285 = sst [smem:[#allocation39_spill]] %s3250_s6 }
   0x7   :  { %3286 = sst [smem:[#allocation40_spill]] %s3252_s8 }
   0x8   :  { %3287 = sst [smem:[#allocation41_spill]] %s3256_s12 }
   0x9   :  { %3288 = sst [smem:[#allocation42_spill]] %s3258_s14 }
   0xa   :  { %3289 = sst [smem:[#allocation43_spill]] %s3260_s16 }
   0xb   :  { %3290 = sst [smem:[#allocation44_spill]] %s3262_s18 }
   0xc   :  { %3291 = sst [smem:[#allocation45_spill]] %s3263_s19 }
   0xd   :  { %27 = vsyncpa [#allocation4], 0 }
   0xe   :  { %29 = vsyncpa [#allocation4 + $0x1], 0 }
   0xf   :  { %30 = vsyncpa [#allocation7], 0 }
  0x10   :  { %32 = vsyncpa [#allocation7 + $0x1], 0 }
  0x11   :  { %33 = vsyncpa [#allocation10], 0 }
  0x12   :  { %34 = vsyncpa [#allocation13], 0 }
  0x13   :  { %35 = vsyncpa [#allocation16], 0 }
  0x14   :  { %36 = vsyncpa [#allocation5], 0 }
  0x15   :  { %38 = vsyncpa [#allocation5 + $0x1], 0 }
  0x16   :  { %39 = vsyncpa [#allocation19], 0 }
  0x17   :  { %41 = vsyncpa [#allocation19 + $0x1], 0  ;;  %s2748_s20 = smov 0   ;;  %s2750_s21 = smov 0  }
  0x18   :  { %s2752_s1 = smov 0   ;;  %s2754_s22 = smov 0  }
  0x19 LB: > { %3292 = sst [smem:[#allocation28_spill]] %s2616_s20  ;;  %s2772_s25 = sadd.s32 4294967295, %s2628_s22   ;;  %s2628_s22 = sphi %s2754_s22, %s3326_s22   ;;  %s2624_s1 = sphi %s2752_s1, %s3328_s1   ;;  %s2620_s21 = sphi %s2750_s21, %s3330_s21   ;;  %s2616_s20 = sphi %s2748_s20, %s3329_s20  }
  0x1a   : > { %3293 = sst [smem:[#allocation29_spill]] %s2624_s1  ;;  %p2005_p0 = scmp.ge.s32.totalorder %s2628_s22, 1 }
  0x1b   : > { %s3294_s23 = sld [smem:[#allocation36_spill]]  ;;  %p68_p1 = scmp.eq.s32.totalorder %s2772_s25, 0 }
  0x1c   : > { %p492_p2 = scmp.lt.s32.totalorder %s2628_s22, 3  ;;  %s2630_s26 = smov [#allocation8]  }
  0x1d   : > { %s505_s27 = sshll.u32 %s2630_s26, 4  ;;  %s3296_s4 = sld [smem:[#allocation38_spill]]  ;;  %s506_s27 = int_to_ptr.vmem [resolvable:$true] %s505_s27 }
  0x1e   : > { %p2777_p3 = pnand %p2005_p0, %p492_p2  ;;  %s3298_s8 = sld [smem:[#allocation40_spill]] }
  0x1f   : > { %s2631_s26 = smov [#allocation9]   ;;  %s3268_s19 = smov 128  }
  0x20   : > { %p2118_p4 = pneg %p2777_p3  ;;  %s522_s18 = sshll.u32 %s2631_s26, 4  ;;  %s523_s18 = int_to_ptr.vmem [resolvable:$true] %s522_s18 }
  0x21   : > { %s503_s24 = sshll.u32 %s3294_s23, 4  ;;  %s3270_s16 = smov 8   ;;  %s504_s24 = int_to_ptr.hbm [resolvable:$true] %s503_s24 }
  0x22   : > { %p2789_p6 = pnand %p2118_p4, %p68_p1  ;;  %s3299_s6 = sld [smem:[#allocation39_spill]] }
  0x23   : > { %s520_s0 = sshll.u32 %s3296_s4, 4  ;;  %s2634_s2 = smov [#allocation12]   ;;  %s521_s0 = int_to_ptr.hbm [resolvable:$true] %s520_s0 }
  0x24   : > { %s554_s23 = sshll.u32 %s3298_s8, 4  ;;  %s556_s26 = sshll.u32 %s2634_s2, 4  ;;  %s555_s23 = int_to_ptr.hbm [resolvable:$true] %s554_s23  ;;  %s557_s26 = int_to_ptr.vmem [resolvable:$true] %s556_s26 }
  0x25   : > { %2121 = dma.hbm_to_vmem [thread:$0]  (!%p2789_p6), %s504_s24, 512, %s506_s27, [#allocation7], %s3268_s19, %s3268_s19, %s3270_s16  }
  0x26   : > { %2124 = dma.hbm_to_vmem [thread:$0]  (!%p2789_p6), %s521_s0, 512, %s523_s18, [#allocation10], %s3268_s19, %s3268_s19, %s3270_s16  }
  0x27   : > { %2130 = dma.hbm_to_vmem [thread:$0]  (!%p2789_p6), %s555_s23, 512, %s557_s26, [#allocation13], %s3268_s19, %s3268_s19, %s3270_s16  }
  0x28   : > { %s537_s17 = sshll.u32 %s3299_s6, 4  ;;  %s2635_s24 = smov [#allocation11]   ;;  %s538_s17 = int_to_ptr.hbm [resolvable:$true] %s537_s17 }
  0x29   : > { %s539_s27 = sshll.u32 %s2635_s24, 4  ;;  %s3300_s12 = sld [smem:[#allocation41_spill]]  ;;  %s540_s27 = int_to_ptr.vmem [resolvable:$true] %s539_s27 }
  0x2a   : > { %2127 = dma.hbm_to_vmem [thread:$0]  (!%p2789_p6), %s538_s17, 512, %s540_s27, [#allocation10], %s3268_s19, %s3268_s19, %s3270_s16  }
  0x2b   : > { %s3301_s14 = sld [smem:[#allocation42_spill]]  ;;  %s2636_s2 = smov [#allocation14]  }
  0x2c   : > { %s579_s4 = sshll.u32 %s2636_s2, 4  ;;  %s2637_s17 = smov [#allocation15]   ;;  %s580_s4 = int_to_ptr.vmem [resolvable:$true] %s579_s4 }
  0x2d   : > { %s596_s26 = sshll.u32 %s2637_s17, 4  ;;  %s2004_s24 = sadd.s32 4294967294, %s2628_s22   ;;  %s597_s26 = int_to_ptr.vmem [resolvable:$true] %s596_s26 }
  0x2e   : > { %s2837_s27 = sadd.s32 1, %s2628_s22   ;;  %s54_s28 = sadd.s32 1, %s2624_s1 }
  0x2f   : > { %s577_s0 = sshll.u32 %s3300_s12, 4  ;;  %3302 = sst [smem:[#allocation30_spill]] %s2837_s27  ;;  %s578_s0 = int_to_ptr.hbm [resolvable:$true] %s577_s0 }
  0x30   : > { %2133 = dma.hbm_to_vmem [thread:$0]  (!%p2789_p6), %s578_s0, 512, %s580_s4, [#allocation13], %s3268_s19, %s3268_s19, %s3270_s16  }
  0x31   : > { %s594_s29 = sshll.u32 %s3301_s14, 4  ;;  %s51_s18 = ssub.s32 %s2628_s22, %s2837_s27  ;;  %s595_s29 = int_to_ptr.hbm [resolvable:$true] %s594_s29 }
  0x32   : > { %2136 = dma.hbm_to_vmem [thread:$0]  (!%p2789_p6), %s595_s29, 512, %s597_s26, [#allocation16], %s3268_s19, %s3268_s19, %s3270_s16  }
  0x33   : > { %p52_p7 = scmp.eq.s32.totalorder %s51_s18, 0  ;;  %p61_p8 = scmp.ne.s32.totalorder %s2624_s1, %s2620_s21 }
  0x34   : > { %p62_p9 = scmp.eq.s32.totalorder %s2628_s22, 0  ;;  %p67_p10 = scmp.ne.s32.totalorder %s2620_s21, %s2616_s20 }
  0x35   : > { %s2848_s0 = scalar_select %p52_p7, %s2624_s1, %s54_s28  }
  0x36   : > { %p2850_p11 = por %p62_p9, %p61_p8  ;;  %p2856_p12 = por %p68_p1, %p67_p10 }
  0x37   : > { %3303 = sst [smem:[#allocation31_spill]] %s2848_s0  ;;  %p453_p13 = scmp.eq.s32.totalorder %s2772_s25, 1 }
  0x38   : > { %p459_p0 = scmp.eq.s32.totalorder %s2004_s24, 1  ;;  %p2157_p2 = scmp.lt.s32.totalorder %s2628_s22, 2 }
  0x39   : > { %s619_s29 = sand.u32 1, %s2624_s1   ;;  %p2863_p4 = por %p453_p13, %p61_p8 }
  0x3a   : > { %p2867_p6 = por %p459_p0, %p67_p10  ;;  %s2871_s17 = sshll.u32 %s619_s29, 4 }
  0x3b   : > { %s3306_s2 = scalar_select %p2863_p4, 1, 0 }
  0x3c   : > { %s3308_s4 = scalar_select %p2867_p6, 1, 0 }
  0x3d   : > { %3307 = sst [smem:[#allocation32_spill]] %s3306_s2  ;;  %s2079_s26 = sshll.u32 %s2628_s22, 4 }
  0x3e   : > { %3309 = sst [smem:[#allocation33_spill]] %s3308_s4  ;;  %s623_s6 = scalar_lea.vmem [#allocation3], %s2871_s17 }
  0x3f   : > { %s3310_s19 = sld [smem:[#allocation34_spill]]  ;;  %s631_s24 = sshll.u32 %s623_s6, 4  ;;  %s632_s24 = int_to_ptr.vmem [resolvable:$true] %s631_s24 }
  0x40   : > { %p2880_p7 = pnand %p2157_p2, %p2850_p11  ;;  %s3312_s1 = sld [smem:[#allocation35_spill]] }
  0x41   : > { %s620_s2 = scalar_lea.sflag [#allocation4], %s619_s29 }
  0x42   : > { %p2454_p9 = pneg %p2880_p7 }
  0x45   : > { %s628_s16 = scalar_lea.hbm %s3310_s19, %s2079_s26  ;;  %s2457_s30 = scalar_lea.hbm %s3310_s19, 32 }
  0x46   : > { %s629_s8 = sshll.u32 %s628_s16, 4  ;;  %s3313_s27 = smov %s3312_s1  ;;  %s630_s8 = int_to_ptr.hbm [resolvable:$true] %s629_s8 }
  0x47   : > { %s650_s4 = scalar_lea.hbm %s3312_s1, %s2079_s26  ;;  %s2450_s18 = sshra.s32 %s630_s8, 4  ;;  %s2451_s18 = int_to_ptr.hbm [resolvable:$true] %s2450_s18 }
  0x48   : > { %s651_s20 = sshll.u32 %s650_s4, 4  ;;  %s2452_s28 = scalar_lea.hbm %s2451_s18, 16  ;;  %s652_s20 = int_to_ptr.hbm [resolvable:$true] %s651_s20 }
  0x49   : > { %p2453_p8 = scmp.ne.s32.totalorder %s2451_s18, %s2452_s28  ;;  %p2458_p13 = scmp.lt.s32.totalorder %s2451_s18, %s3310_s19 }
  0x4a   : > { %p2459_p0 = scmp.lt.s32.totalorder %s2457_s30, %s2452_s28 }
  0x4b   : > { %p2455_p10 = pnand %p2454_p9, %p2453_p8 }
  0x4c   : > { %p2460_p2 = por %p2459_p0, %p2458_p13 }
  0x4d   : > { %p2456_p11 = pneg %p2455_p10 }
  0x4f   : > { %p2461_p5 = pnand %p2460_p2, %p2456_p11 }
  0x51   : > { %2464 = shalt.err (!%p2461_p5)
}
  0x52   : > { %s3314_s1 = smov 8   ;;  %s3315_s29 = smov 128  }
  0x53   : > { %2140 = dma.hbm_to_vmem [thread:$0]  (!%p2880_p7), %s630_s8, 256, %s632_s24, %s620_s2, %s3315_s29, %s3315_s29, %s3314_s1  }
  0x54   : > { %s645_s4 = scalar_lea.vmem [#allocation6], %s2871_s17  ;;  %s641_s6 = sand.u32 1, %s2628_s22  }
  0x55   : > { %s653_s26 = sshll.u32 %s645_s4, 4  ;;  %s642_s16 = scalar_lea.sflag [#allocation7], %s641_s6  ;;  %s654_s26 = int_to_ptr.vmem [resolvable:$true] %s653_s26 }
  0x56   : > { %s2480_s18 = sshra.s32 %s652_s20, 4  ;;  %s2487_s0 = scalar_lea.hbm %s3313_s27, 32  ;;  %s2481_s18 = int_to_ptr.hbm [resolvable:$true] %s2480_s18 }
  0x57   : > { %s2482_s28 = scalar_lea.hbm %s2481_s18, 16  ;;  %p2488_p11 = scmp.lt.s32.totalorder %s2481_s18, %s3313_s27 }
  0x58   : > { %p2483_p8 = scmp.ne.s32.totalorder %s2481_s18, %s2482_s28  ;;  %p2489_p13 = scmp.lt.s32.totalorder %s2487_s0, %s2482_s28 }
  0x5a   : > { %p2485_p5 = pnand %p2483_p8, %p2454_p9  ;;  %p2490_p0 = por %p2489_p13, %p2488_p11 }
  0x5c   : > { %p2486_p10 = pneg %p2485_p5 }
  0x5e   : > { %p2491_p2 = pnand %p2490_p0, %p2486_p10 }
  0x60   : > { %2494 = shalt.err (!%p2491_p2)
}
  0x61   : > { %2143 = dma.hbm_to_vmem [thread:$0]  (!%p2880_p7), %s652_s20, 256, %s654_s26, %s642_s16, %s3315_s29, %s3315_s29, %s3314_s1  }
  0x62   : > { %665 = sbr.rel (%p2777_p3) target bundleno = 2762 (0xaca), region = 92  ;;  %s2922_s2 = sand.u32 (!%p2777_p3), 1, %s2620_s21  }
  0x63   : > { %s2925_s19 = sshll.u32 (!%p2777_p3), %s2922_s2, 4  ;;  %s668_s17 = scalar_lea.sflag (!%p2777_p3), [#allocation4], %s2922_s2 }
  0x64   : > { %s671_s24 = scalar_lea.vmem (!%p2777_p3), [#allocation3], %s2925_s19 }
  0x67   : > { %2583 = dma.done.wait (%p2856_p12), %s668_s17, 256  }
  0x68   : > { %2585 = vsyncadd (%p2856_p12), %s668_s17, 4294967040  ;;  %s677_s12 = sand.u32 1, %s2772_s25   ;;  %s681_s3 = scalar_lea.vmem [#allocation6], %s2925_s19 }
  0x69   : > { %s678_s20 = scalar_lea.sflag [#allocation7], %s677_s12 }
  0x6a   : > { %2587 = dma.done.wait (%p2856_p12), %s678_s20, 256  }
  0x6b   : > { %2589 = vsyncadd (%p2856_p12), %s678_s20, 4294967040 }
  0x6c   : > { %2591 = dma.done.wait (%p68_p1), [#allocation7], 512  }
  0x6d   : > { %2593 = vsyncadd (%p68_p1), [#allocation7], 4294966784 }
  0x6e   : > { %2595 = dma.done.wait (%p68_p1), [#allocation10], 1024  }
  0x6f   : > { %2597 = vsyncadd (%p68_p1), [#allocation10], 4294966272 }
  0x70   : > { %2599 = dma.done.wait (%p68_p1), [#allocation13], 1024  }
  0x71   : > { %2601 = vsyncadd (%p68_p1), [#allocation13], 4294966272 }
  0x72   : > { %2603 = dma.done.wait (%p68_p1), [#allocation16], 512  }
  0x73   : > { %2605 = vsyncadd (%p68_p1), [#allocation16], 4294966784  ;;  %v825_v1 = vld [vmem:[#allocation9 + $0x18] sm:$0xff]  ;;  %v824_v3 = vld [vmem:[#allocation9 + $0x10] sm:$0xff]  ;;  %vm792_vm0 = vcmask 261120   ;;  %s3316_s26 = sld [smem:[#allocation37_spill]]  ;;  %v890_v31 = vlaneseq }
  0x74   : > { %v787_v2 = vld [vmem:[#allocation8 + $0x18] sm:$0xff]  ;;  %848 = vmatpush.msra.mxu1 %v825_v1  ;;  %v786_v4 = vld [vmem:[#allocation8 + $0x10] sm:$0xff]  ;;  %v823_v5 = vld [vmem:[#allocation9 + $0x8] sm:$0xff]  ;;  %vm897_vm1 = vcmask 64512   ;;  %s2638_s6 = smov 120   ;;  %s2639_s28 = smov 112  }
  0x75   : > { %811 = vmatpush.msra.mxu0 %v787_v2  ;;  %2082 = vmatpush.msra.mxu2 %v787_v2  ;;  %v785_v6 = vld [vmem:[#allocation8 + $0x8] sm:$0xff]  ;;  %v822_v7 = vld [vmem:[#allocation9] sm:$0xff]  ;;  %v862_v12 = vld [vmem:[#allocation11 + $0x18] sm:$0xff]  ;;  %v891_v35 = vshrl.u32 %v890_v31, 7  ;;  %v3010_v36 = vand.u32 127, %v890_v31  ;;  %s2640_s30 = smov 104  }
  0x76   : > { %849 = vmatpush.msra.mxu1 %v824_v3  ;;  %v784_v8 = vld [vmem:[#allocation8] sm:$0xff]  ;;  %v2963_v11 = vld [vmem:[%s671_s24 + $0x8] sm:$0xff]  ;;  %v861_v13 = vld [vmem:[#allocation11 + $0x10] sm:$0xff]  ;;  %s3123_s14 = scalar_lea.vmem [#allocation18], %s2925_s19  ;;  %s2081_s16 = sshll.u32 %s2772_s25, 4 }
  0x77   : > { %812 = vmatpush.msra.mxu0 %v786_v4  ;;  %2083 = vmatpush.msra.mxu2 %v786_v4  ;;  %v782_v9 = vld [vmem:[%s681_s3] sm:$0xff]  ;;  %v860_v14 = vld [vmem:[#allocation11 + $0x8] sm:$0xff]  ;;  %v2218_v16 = vld [vmem:[%s3249_s5] ss:$0 sm:$0xff]  ;;  %vm3016_vm2 = vcmp.gt.s32.totalorder %v3010_v36, %v891_v35  ;;  %s1815_s18 = sshll.u32 %s3123_s14, 4  ;;  %s3321_s0 = sld [smem:[#allocation45_spill]]  ;;  %s1816_s18 = int_to_ptr.vmem [resolvable:$true] %s1815_s18 }
  0x78   : > { %v2959_v10 = vld [vmem:[%s671_s24] sm:$0xff]  ;;  %850 = vmatpush.msra.mxu1 %v823_v5  ;;  %v783_v22 = vld [vmem:[%s681_s3 + $0x8] sm:$0xff]  ;;  %s1789_s17 = scalar_lea.sflag [#allocation19], %s2922_s2 }
  0x79   : > { %813 = vmatpush.msra.mxu0 %v785_v6  ;;  %2084 = vmatpush.msra.mxu2 %v785_v6  ;;  %v859_v15 = vld [vmem:[#allocation11] sm:$0xff]  ;;  %v2219_v17 = vld [vmem:[%s3316_s26] ss:$0 sm:$0xff]  ;;  %s3319_s26 = sld [smem:[#allocation43_spill]] }
  0x7a   : > { %851 = vmatpush.msra.mxu1 %v822_v7  ;;  %v2220_v26 = vld [vmem:[%s3251_s7] ss:$0 sm:$0xff]  ;;  %v1024_v7 = vld [vmem:[#allocation12] sm:$0xff] }
  0x7b   : > { %814 = vmatpush.msra.mxu0 %v784_v8  ;;  %2032 = vmatmul.msk.f32.vlgmr.msra.gmra.mxu1 %vm792_vm0, %v782_v9 }
  0x7c   : > { %2085 = vmatpush.msra.mxu2 %v784_v8  ;;  %2030 = vmatmul.msk.f32.vlgmr.msra.gmra.mxu0 %vm792_vm0, %v2959_v10 }
  0x7d   : > { %2031 = vmatmul.msk.f32.vlgmr.msra.gmra.mxu2 %vm792_vm0, %v2963_v11  ;;  %s1814_s8 = scalar_lea.hbm %s3321_s0, %s2081_s16  ;;  %s2530_s3 = scalar_lea.hbm %s3321_s0, 32 }
  0x7e   : > { %879 = vmatpush.msrb.mxu2 %v862_v12  ;;  %s1817_s19 = sshll.u32 %s1814_s8, 4  ;;  %s1818_s19 = int_to_ptr.hbm [resolvable:$true] %s1817_s19 }
  0x7f   : > { %s2524_s24 = sshra.s32 %s1818_s19, 4  ;;  %s2525_s24 = int_to_ptr.hbm [resolvable:$true] %s2524_s24 }
  0x80   : > { %880 = vmatpush.msrb.mxu2 %v861_v13  ;;  %s2526_s12 = scalar_lea.hbm %s2525_s24, 16  ;;  %p2531_p7 = scmp.lt.s32.totalorder %s2525_s24, %s3321_s0 }
  0x81   : > { %p2527_p1 = scmp.ne.s32.totalorder %s2525_s24, %s2526_s12  ;;  %p2532_p9 = scmp.lt.s32.totalorder %s2530_s3, %s2526_s12 }
  0x82   : > { %881 = vmatpush.msrb.mxu2 %v860_v14 }
  0x83   : > { %2033 = vmatmul.msk.f32.gmra.mxu1 %vm792_vm0, %v783_v22  ;;  %p2528_p3 = pnand %p2527_p1, %p2863_p4  ;;  %p2533_p8 = por %p2532_p9, %p2531_p7 }
  0x84   : > { %882 = vmatpush.msrb.mxu2 %v859_v15 }
  0x85   : > { %2034 = vmatmul.msk.f32.vlgmr.msrb.gmra.mxu2 %vm792_vm0, %v782_v9  ;;  %p2529_p12 = pneg %p2528_p3 }
  0x87   : > { %p2534_p5 = pnand %p2533_p8, %p2529_p12 }
  0x8d   : > { %2035 = vmatmul.msk.f32.gmra.mxu2 %vm792_vm0, %v783_v22 }
  0xf8   : > { %v853_v18 = vpop.f32.mrf.mxu1 }
  0xf9   : > { %v2977_v19 = vadd.f32 %v2218_v16, %v853_v18  ;;  %v816_v20 = vpop.f32.mrf.mxu0  ;;  %v1161_v18 = vld [vmem:[#allocation12 + $0x8] sm:$0xff] }
  0xfa   : > { %v817_v21 = vadd.f32 %v2219_v17, %v816_v20 }
  0xfb   : > { %1027 = vrot.lane.b32.xlu0 %v2977_v19, %s2638_s6  ;;  %2036 = vmatpush.xpose.msk.msra.mxu3 %vm897_vm1, %v2977_v19 }
  0xfc   : > { %v2985_v23 = vmul.f32 0.35355338, %v817_v21 }
  0xfe   : > { %2037 = vmatmul.msk.f32.vlgmr.msra.gmra.mxu3 %vm897_vm1, %v2985_v23 }
 0x100   : > { %v819_v24 = vpop.f32.mrf.mxu2  ;;  %v856_v32 = vpop.f32.mrf.mxu1 }
 0x101   : > { %v820_v25 = vadd.f32 %v2219_v17, %v819_v24  ;;  %v3006_v33 = vadd.f32 %v2218_v16, %v856_v32 }
 0x103   : > { %1025 = vrot.lane.b32.xlu0 %v2985_v23, %s2638_s6  ;;  %v3008_v34 = vmul.f32 0.35355338, %v820_v25  ;;  %2038 = vmatpush.xpose.msk.msrb.mxu3 %vm897_vm1, %v3006_v33 }
 0x106   : > { %2039 = vmatmul.msk.f32.vlgmr.msrb.gmra.mxu3 %vm897_vm1, %v3008_v34 }
 0x108   : > { %v884_v27 = vpop.f32.mrf.mxu2 }
 0x109   : > { %v2996_v28 = vadd.f32 %v2220_v26, %v884_v27 }
 0x10b   : > { %1108 = vrot.lane.b32.xlu0 %v2996_v28, %s2638_s6  ;;  %996 = vmatpush.msra.mxu3 %v2996_v28 }
 0x110   : > { %v887_v53 = vpop.f32.mrf.mxu2 }
 0x111   : > { %v3034_v54 = vadd.f32 %v2220_v26, %v887_v53 }
 0x113   : > { %1222 = vrot.lane.b32.xlu0 %v2977_v19, %s2639_s28  ;;  %1019 = vmatpush.msrb.mxu0 %v3034_v54 }
 0x11b   : > { %1220 = vrot.lane.b32.xlu0 %v2985_v23, %s2639_s28 }
 0x16d   : > { %v1028_v29 = vpop.permute.xlu0 %1027 }
 0x16e   : > { %2042 = vmatpush.xpose.msk.msrb.mxu1 %vm897_vm1, %v1028_v29 }
 0x172   : > { %1183 = vmatpush.msra.mxu1 %v1161_v18 }
 0x175   : > { %v1026_v30 = vpop.permute.xlu0 %1025 }
 0x176   : > { %2043 = vmatmul.msk.f32.vlgmr.msrb.gmra.mxu1 %vm897_vm1, %v1026_v30 }
 0x17d   : > { %v1109_v37 = vpop.permute.xlu0 %1108 }
 0x17e   : > { %1129 = vmatpush.msrb.mxu3 %v1109_v37 }
 0x181   : > { %v921_v39 = vpop.f32.mrf.mxu3 }
 0x182   : > { %v952_v40 = vsel %vm3016_vm2, -1e+30, %v921_v39 }
 0x183   : > { %v954_v41 = vsel %vm897_vm1, %v952_v40, -inf }
 0x184   : > { %955 = vmax.xlane.f32.xlu1 %v954_v41 }
 0x185   : > { %v1223_v63 = vpop.permute.xlu0 %1222 }
 0x189   : > { %v947_v49 = vpop.f32.mrf.mxu3 }
 0x18a   : > { %v953_v51 = vsel %vm3016_vm2, -1e+30, %v947_v49 }
 0x18b   : > { %v957_v52 = vsel %vm897_vm1, %v953_v51, -inf }
 0x18c   : > { %958 = vmax.xlane.f32.xlu0 %v957_v52 }
 0x18d   : > { %v1221_v1 = vpop.permute.xlu0 %1220 }
 0x1f3   : > { %v1050_v42 = vpop.f32.mrf.mxu1 }
 0x1f4   : > { %v1081_v43 = vsel %vm3016_vm2, -1e+30, %v1050_v42 }
 0x1f5   : > { %v1083_v44 = vsel %vm897_vm1, %v1081_v43, -inf }
 0x1f6   : > { %1084 = vmax.xlane.f32.xlu1 %v1083_v44 }
 0x1f7   : > { %v956_v45 = vpop.xlane.xlu1 %955 }
 0x1f8   : > { %v960_v46 = vsub.f32 %v952_v40, %v956_v45 }
 0x1fa   : > { %v962_v47 = vmul.f32 1.442695, %v960_v46 }
 0x1fc   : > { %2228 = vpow2.f32 %v962_v47 }
 0x1ff   : > { %v959_v2 = vpop.xlane.xlu0 %958 }
 0x200   : > { %v961_v3 = vsub.f32 %v953_v51, %v959_v2 }
 0x202   : > { %v2229_v48 = vpop.eup %2228  ;;  %v964_v4 = vmul.f32 1.442695, %v961_v3 }
 0x203   : > { %v966_v50 = vsel %vm897_vm1, %v2229_v48, 0.0 }
 0x204   : > { %967 = vadd.xlane.f32.xlu2 %v966_v50 }
 0x20f   : > { %1055 = vrot.lane.b32.xlu1 %v3006_v33, %s2638_s6 }
 0x269   : > { %v1085_v55 = vpop.xlane.xlu1 %1084 }
 0x26a   : > { %v1089_v56 = vsub.f32 %v1081_v43, %v1085_v55 }
 0x26c   : > { %v1091_v57 = vmul.f32 1.442695, %v1089_v56 }
 0x26e   : > { %2230 = vpow2.f32 %v1091_v57  ;;  %v1354_v57 = vld [vmem:[#allocation12 + $0x10] sm:$0xff] }
 0x26f   : > { %1376 = vmatpush.msrb.mxu1 %v1354_v57 }
 0x274   : > { %v2231_v58 = vpop.eup %2230 }
 0x275   : > { %v1095_v59 = vsel %vm897_vm1, %v2231_v58, 0.0 }
 0x276   : > { %1096 = vadd.xlane.f32.xlu2 %v1095_v59 }
 0x277   : > { %v968_v60 = vpop.xlane.xlu2 %967 }
 0x278   : > { %2232 = vrcp.f32 %v968_v60 }
 0x279   : > { %2234 = vpow2.f32 %v964_v4 }
 0x27e   : > { %v2233_v61 = vpop.eup %2232 }
 0x27f   : > { %v3038_v62 = vmul.f32 %v2233_v61, %v2229_v48  ;;  %v2235_v5 = vpop.eup %2234 }
 0x280   : > { %v969_v6 = vsel %vm897_vm1, %v2235_v5, 0.0 }
 0x281   : > { %2040 = vmatmul.msk.f32.vlgmr.msra.gmra.mxu3 %vm897_vm1, %v3038_v62  ;;  %v1056_v0 = vpop.permute.xlu1 %1055 }
 0x282   : > { %2052 = vmatpush.xpose.msk.msra.mxu3 %vm897_vm1, %v1223_v63  ;;  %2044 = vmatpush.xpose.msk.msra.mxu2 %vm897_vm1, %v1056_v0 }
 0x286   : > { %1212 = vmatpush.msrb.mxu2 %v1024_v7 }
 0x28e   : > { %1053 = vrot.lane.b32.xlu2 %v3008_v34, %s2638_s6 }
 0x2b7   : > { %970 = vadd.xlane.f32.xlu2 %v969_v6 }
 0x2e9   : > { %v1097_v8 = vpop.xlane.xlu2 %1096 }
 0x2ea   : > { %2236 = vrcp.f32 %v1097_v8 }
 0x2f0   : > { %v2237_v9 = vpop.eup %2236 }
 0x2f1   : > { %v1103_v12 = vmul.f32 %v2237_v9, %v2231_v58  ;;  %v1054_v13 = vpop.permute.xlu2 %1053 }
 0x2f2   : > { %2045 = vmatmul.msk.f32.vlgmr.msra.gmra.mxu2 %vm897_vm1, %v1054_v13 }
 0x2f3   : > { %2046 = vmatmul.msk.f32.vlgmr.msrb.gmra.mxu3 %vm897_vm1, %v1103_v12  ;;  %v1105_v50 = vadd.f32 %v1103_v12, %v3038_v62 }
 0x2fb   : > { %2053 = vmatmul.msk.f32.vlgmr.msra.gmra.mxu3 %vm897_vm1, %v1221_v1 }
 0x304   : > { %v998_v14 = vpop.f32.mrf.mxu3 }
 0x305   : > { %2050 = vmatmul.msk.f32.vlgmr.msrb.gmra.mxu2 %vm897_vm1, %v998_v14 }
 0x32a   : > { %v971_v15 = vpop.xlane.xlu2 %970 }
 0x32b   : > { %2238 = vrcp.f32 %v971_v15 }
 0x331   : > { %v2239_v16 = vpop.eup %2238 }
 0x332   : > { %v3051_v17 = vmul.f32 %v2239_v16, %v2235_v5 }
 0x334   : > { %2041 = vmatmul.msk.f32.vlgmr.msrb.gmra.mxu0 %vm897_vm1, %v3051_v17 }
 0x375   : > { %v1078_v20 = vpop.f32.mrf.mxu2 }
 0x376   : > { %v1082_v21 = vsel %vm3016_vm2, -1e+30, %v1078_v20  ;;  %v1131_v22 = vpop.f32.mrf.mxu3 }
 0x377   : > { %2048 = vmatmul.msk.f32.vlgmr.msra.gmra.mxu1 %vm897_vm1, %v1131_v22  ;;  %v1086_v24 = vsel %vm897_vm1, %v1082_v21, -inf }
 0x378   : > { %1087 = vmax.xlane.f32.xlu1 %v1086_v24 }
 0x37e   : > { %v1245_v25 = vpop.f32.mrf.mxu3 }
 0x37f   : > { %v1276_v26 = vsel %vm3016_vm2, -1e+30, %v1245_v25 }
 0x380   : > { %v1278_v27 = vsel %vm897_vm1, %v1276_v26, -inf }
 0x381   : > { %1279 = vmax.xlane.f32.xlu2 %v1278_v27  ;;  %v2212_v27 = vpack.i.bf16 %v3034_v54, %v2996_v28 }
 0x388   : > { %v3099_v62 = vpop.f32.mrf.mxu2 }
 0x391   : > { %1250 = vrot.lane.b32.xlu1 %v3006_v33, %s2639_s28 }
 0x399   : > { %1135 = vrot.lane.b32.xlu2 %v3034_v54, %s2638_s6 }
 0x3a1   : > { %1248 = vrot.lane.b32.xlu2 %v3008_v34, %s2639_s28 }
 0x3a9   : > { %1414 = vrot.lane.b32.xlu2 %v3008_v34, %s2640_s30 }
 0x3b1   : > { %v1021_v29 = vpop.f32.mrf.mxu0 }
 0x3b2   : > { %2051 = vmatmul.msk.f32.gmra.mxu2 %vm897_vm1, %v1021_v29 }
 0x3eb   : > { %v1088_v30 = vpop.xlane.xlu1 %1087 }
 0x3ec   : > { %v1090_v31 = vsub.f32 %v1082_v21, %v1088_v30 }
 0x3ee   : > { %v1093_v32 = vmul.f32 1.442695, %v1090_v31 }
 0x3f0   : > { %2240 = vpow2.f32 %v1093_v32 }
 0x3f4   : > { %v1280_v35 = vpop.xlane.xlu2 %1279 }
 0x3f5   : > { %v1284_v37 = vsub.f32 %v1276_v26, %v1280_v35 }
 0x3f6   : > { %v2241_v39 = vpop.eup %2240 }
 0x3f7   : > { %v1286_v40 = vmul.f32 1.442695, %v1284_v37  ;;  %v1098_v41 = vsel %vm897_vm1, %v2241_v39, 0.0 }
 0x3f8   : > { %1099 = vadd.xlane.f32.xlu0 %v1098_v41 }
 0x3f9   : > { %2242 = vpow2.f32 %v1286_v40 }
 0x3fc   : > { %v1136_v42 = vpop.permute.xlu2 %1135 }
 0x3fd   : > { %1156 = vmatpush.msra.mxu0 %v1136_v42 }
 0x3ff   : > { %v2243_v43 = vpop.eup %2242 }
 0x400   : > { %v1290_v34 = vsel %vm897_vm1, %v2243_v43, 0.0 }
 0x401   : > { %1291 = vadd.xlane.f32.xlu1 %v1290_v34 }
 0x403   : > { %v1251_v44 = vpop.permute.xlu1 %1250 }
 0x404   : > { %2054 = vmatpush.xpose.msk.msrb.mxu0 %vm897_vm1, %v1251_v44 }
 0x40c   : > { %1302 = vrot.lane.b32.xlu0 %v2996_v28, %s2639_s28 }
 0x414   : > { %1388 = vrot.lane.b32.xlu0 %v2977_v19, %s2640_s30  ;;  %v1249_v19 = vpop.permute.xlu2 %1248 }
 0x41a   : > { %1416 = vrot.lane.b32.xlu1 %v3006_v33, %s2640_s30 }
 0x41c   : > { %1386 = vrot.lane.b32.xlu0 %v2985_v23, %s2640_s30  ;;  %v1415_v56 = vpop.permute.xlu2 %1414 }
 0x435   : > { %v3102_v0 = vpop.f32.mrf.mxu2 }
 0x46b   : > { %v1100_v45 = vpop.xlane.xlu0 %1099 }
 0x46c   : > { %2244 = vrcp.f32 %v1100_v45 }
 0x472   : > { %v2245_v46 = vpop.eup %2244 }
 0x473   : > { %v3082_v47 = vmul.f32 %v2245_v46, %v2241_v39 }
 0x474   : > { %v1292_v48 = vpop.xlane.xlu1 %1291 }
 0x475   : > { %2246 = vrcp.f32 %v1292_v48  ;;  %2047 = vmatmul.msk.f32.vlgmr.msra.gmra.mxu0 %vm897_vm1, %v3082_v47  ;;  %v1106_v39 = vadd.f32 %v3082_v47, %v3051_v17  ;;  %v1520_v48 = vld [vmem:[#allocation12 + $0x18] sm:$0xff] }
 0x47b   : > { %v2247_v49 = vpop.eup %2246 }
 0x47c   : > { %v1298_v51 = vmul.f32 %v2247_v49, %v2243_v43 }
 0x47d   : > { %2055 = vmatmul.msk.f32.vlgmr.msrb.gmra.mxu0 %vm897_vm1, %v1249_v19  ;;  %v1185_v19 = vpop.f32.mrf.mxu1 }
 0x47e   : > { %v3088_v33 = vadd.f32 %v1298_v51, %v1105_v50  ;;  %v1303_v23 = vpop.permute.xlu0 %1302 }
 0x47f   : > { %1323 = vmatpush.msrb.mxu3 %v1303_v23  ;;  %v1215_v23 = vadd.f32 %v3099_v62, %v1185_v19 }
 0x480   : > { %2056 = vmatmul.msk.f32.vlgmr.msrb.gmra.mxu3 %vm897_vm1, %v1298_v51 }
 0x486   : > { %v1389_v52 = vpop.permute.xlu0 %1388 }
 0x487   : > { %2060 = vmatpush.xpose.msk.msra.mxu2 %vm897_vm1, %v1389_v52 }
 0x48c   : > { %v1417_v53 = vpop.permute.xlu1 %1416 }
 0x48d   : > { %2062 = vmatpush.xpose.msk.msra.mxu3 %vm897_vm1, %v1417_v53  ;;  %v2221_v53 = vld [vmem:[%s3253_s9] ss:$0 sm:$0xff] }
 0x48e   : > { %v1387_v55 = vpop.permute.xlu0 %1386 }
 0x48f   : > { %2061 = vmatmul.msk.f32.vlgmr.msra.gmra.mxu2 %vm897_vm1, %v1387_v55 }
 0x490   : > { %2063 = vmatmul.msk.f32.vlgmr.msra.gmra.mxu3 %vm897_vm1, %v1415_v56 }
 0x491   : > { %1542 = vmatpush.msrb.mxu3 %v1520_v48 }
 0x4f2   : > { %v1158_v58 = vpop.f32.mrf.mxu0 }
 0x4f3   : > { %2049 = vmatmul.msk.f32.gmra.mxu1 %vm897_vm1, %v1158_v58 }
 0x4fa   : > { %v1273_v59 = vpop.f32.mrf.mxu0 }
 0x4fb   : > { %v1277_v60 = vsel %vm3016_vm2, -1e+30, %v1273_v59 }
 0x4fc   : > { %v1281_v61 = vsel %vm897_vm1, %v1277_v60, -inf }
 0x4fd   : > { %1282 = vmax.xlane.f32.xlu1 %v1281_v61 }
 0x503   : > { %v1325_v63 = vpop.f32.mrf.mxu3 }
 0x504   : > { %2058 = vmatmul.msk.f32.vlgmr.msrb.gmra.mxu1 %vm897_vm1, %v1325_v63 }
 0x512   : > { %v1411_v1 = vpop.f32.mrf.mxu2 }
 0x513   : > { %v1442_v2 = vsel %vm3016_vm2, -1e+30, %v1411_v1  ;;  %v1439_v3 = vpop.f32.mrf.mxu3 }
 0x514   : > { %v1443_v4 = vsel %vm3016_vm2, -1e+30, %v1439_v3  ;;  %v1444_v5 = vsel %vm897_vm1, %v1442_v2, -inf }
 0x515   : > { %1445 = vmax.xlane.f32.xlu0 %v1444_v5  ;;  %v1447_v6 = vsel %vm897_vm1, %v1443_v4, -inf  ;;  %v2641_v5 = vmov 32.0  }
 0x516   : > { %1448 = vmax.xlane.f32.xlu2 %v1447_v6 }
 0x52e   : > { %1328 = vrot.lane.b32.xlu2 %v3034_v54, %s2639_s28 }
 0x570   : > { %v1283_v7 = vpop.xlane.xlu1 %1282  ;;  %v1188_v51 = vpop.f32.mrf.mxu1 }
 0x571   : > { %v1285_v8 = vsub.f32 %v1277_v60, %v1283_v7  ;;  %v1218_v59 = vadd.f32 %v3102_v0, %v1188_v51 }
 0x573   : > { %v1288_v9 = vmul.f32 1.442695, %v1285_v8 }
 0x575   : > { %2248 = vpow2.f32 %v1288_v9 }
 0x57b   : > { %v2249_v12 = vpop.eup %2248 }
 0x57c   : > { %v1293_v13 = vsel %vm897_vm1, %v2249_v12, 0.0 }
 0x57d   : > { %1294 = vadd.xlane.f32.xlu1 %v1293_v13 }
 0x588   : > { %v1446_v14 = vpop.xlane.xlu0 %1445 }
 0x589   : > { %v1450_v38 = vsub.f32 %v1442_v2, %v1446_v14  ;;  %v1449_v15 = vpop.xlane.xlu2 %1448 }
 0x58a   : > { %v1451_v16 = vsub.f32 %v1443_v4, %v1449_v15 }
 0x58b   : > { %v1452_v18 = vmul.f32 1.442695, %v1450_v38 }
 0x58c   : > { %v1454_v20 = vmul.f32 1.442695, %v1451_v16 }
 0x58d   : > { %2250 = vpow2.f32 %v1452_v18 }
 0x58e   : > { %2252 = vpow2.f32 %v1454_v20 }
 0x591   : > { %v1329_v21 = vpop.permute.xlu2 %1328 }
 0x592   : > { %1349 = vmatpush.msra.mxu0 %v1329_v21 }
 0x593   : > { %v2251_v22 = vpop.eup %2250 }
 0x594   : > { %v2253_v24 = vpop.eup %2252  ;;  %v1456_v25 = vsel %vm897_vm1, %v2251_v22, 0.0 }
 0x595   : > { %1457 = vadd.xlane.f32.xlu0 %v1456_v25  ;;  %v1459_v26 = vsel %vm897_vm1, %v2253_v24, 0.0  ;;  %v1628_v25 = vld [vmem:[#allocation14 + $0x8] sm:$0xff] }
 0x596   : > { %1460 = vadd.xlane.f32.xlu1 %v1459_v26  ;;  %v1627_v26 = vld [vmem:[#allocation14] sm:$0xff] }
 0x5a9   : > { %2213 = vrot.lane.b32.xlu0 %v2212_v27, %s2640_s30 }
 0x5f0   : > { %v1295_v29 = vpop.xlane.xlu1 %1294 }
 0x5f1   : > { %2254 = vrcp.f32 %v1295_v29 }
 0x5f7   : > { %v2255_v30 = vpop.eup %2254 }
 0x5f8   : > { %v1299_v31 = vmul.f32 %v2255_v30, %v2249_v12 }
 0x5fa   : > { %2057 = vmatmul.msk.f32.vlgmr.msra.gmra.mxu0 %vm897_vm1, %v1299_v31  ;;  %v1301_v28 = vadd.f32 %v1299_v31, %v1106_v39  ;;  %v1669_v31 = vld [vmem:[#allocation15 + $0x18] sm:$0xff] }
 0x5fb   : > { %1692 = vmatpush.msra.mxu1 %v1669_v31 }
 0x608   : > { %v1458_v32 = vpop.xlane.xlu0 %1457 }
 0x609   : > { %2256 = vrcp.f32 %v1458_v32  ;;  %v1461_v35 = vpop.xlane.xlu1 %1460 }
 0x60a   : > { %2258 = vrcp.f32 %v1461_v35 }
 0x60b   : > { %2260 = vrcp.f32 %v2641_v5 }
 0x60f   : > { %v2257_v37 = vpop.eup %2256 }
 0x610   : > { %v2259_v40 = vpop.eup %2258  ;;  %v1464_v41 = vmul.f32 %v2257_v37, %v2251_v22  ;;  %v1630_v22 = vld [vmem:[#allocation14 + $0x18] sm:$0xff] }
 0x611   : > { %v1465_v54 = vmul.f32 %v2259_v40, %v2253_v24  ;;  %v2261_v6 = vpop.eup %2260  ;;  %v1629_v24 = vld [vmem:[#allocation14 + $0x10] sm:$0xff] }
 0x612   : > { %v1466_v42 = vadd.f32 %v1464_v41, %v3088_v33  ;;  %v1378_v33 = vpop.f32.mrf.mxu1  ;;  %v1571_v7 = vmul.f32 32.0, %v2261_v6  ;;  %vm1575_vm3 = vweird.f32 %v2261_v6 }
 0x613   : > { %v1467_v43 = vadd.f32 %v1465_v54, %v1301_v28  ;;  %v1384_v52 = vadd.f32 %v1378_v33, %v1215_v23 }
 0x614   : > { %v1552_v34 = vmul.f32 0.25, %v1466_v42  ;;  %v1572_v8 = vsub.f32 1.0, %v1571_v7 }
 0x615   : > { %v1553_v44 = vmul.f32 0.25, %v1467_v43 }
 0x616   : > { %1554 = vst.msk [vmem:[%s3123_s14] sm:$0xff] %vm897_vm1, %v1552_v34  ;;  %v1573_v0 = vmul.f32 %v2261_v6, %v1572_v8 }
 0x617   : > { %1555 = vst.msk [vmem:[%s3123_s14 + $0x8] sm:$0xff] %vm897_vm1, %v1553_v44  ;;  %v3154_v44 = vld [vmem:[%s3254_s10] ss:$0 sm:$0xff] }
 0x618   : > { %v1574_v9 = vadd.f32 %v2261_v6, %v1573_v0 }
 0x61b   : > { %v2214_v45 = vpop.permute.xlu0 %2213 }
 0x61c   : > { %v2216_v46 = vunpack.i.h.bf16 %v2214_v45  ;;  %v2215_v17 = vunpack.i.l.bf16 %v2214_v45 }
 0x61e   : > { %1489 = vmatpush.msrb.mxu0 %v2215_v17  ;;  %1515 = vmatpush.msrb.mxu2 %v2216_v46 }
 0x61f   : > { %2064 = vmatmul.msk.f32.vlgmr.msrb.gmra.mxu0 %vm897_vm1, %v1464_v41  ;;  %2065 = vmatmul.msk.f32.vlgmr.msrb.gmra.mxu2 %vm897_vm1, %v1465_v54 }
 0x620   : > { %1653 = vmatpush.msra.mxu0 %v1630_v22  ;;  %v2642_v22 = vmov 0  }
 0x621   : > { %2217 = vset.pattern.permute.xlu0 %v2642_v22 }
 0x622   : > { %1654 = vmatpush.msra.mxu0 %v1629_v24 }
 0x624   : > { %1655 = vmatpush.msra.mxu0 %v1628_v25  ;;  %v2227_v25 = vld [vmem:[#allocation2] ss:$0 sm:$0xff] }
 0x626   : > { %1656 = vmatpush.msra.mxu0 %v1627_v26 }
 0x677   : > { %v1351_v47 = vpop.f32.mrf.mxu0 }
 0x678   : > { %2059 = vmatmul.msk.f32.gmra.mxu1 %vm897_vm1, %v1351_v47  ;;  %v3159_v47 = vld [vmem:[%s3255_s11] ss:$0 sm:$0xff] }
 0x69c   : > { %v1491_v49 = vpop.f32.mrf.mxu0 }
 0x69d   : > { %2066 = vmatmul.msk.f32.vlgmr.msrb.gmra.mxu3 %vm897_vm1, %v1491_v49 }
 0x6a2   : > { %v1517_v50 = vpop.f32.mrf.mxu2 }
 0x6a5   : > { %2067 = vmatmul.msk.f32.gmra.mxu3 %vm897_vm1, %v1517_v50 }
 0x6f5   : > { %v1381_v58 = vpop.f32.mrf.mxu1 }
 0x6f6   : > { %v1385_v61 = vadd.f32 %v1381_v58, %v1218_v59  ;;  %v2224_v58 = vld [vmem:[%s3257_s13] ss:$0 sm:$0xff] }
 0x720   : > { %v1544_v55 = vpop.f32.mrf.mxu3 }
 0x721   : > { %v1550_v56 = vadd.f32 %v1544_v55, %v1384_v52  ;;  %v1668_v55 = vld [vmem:[#allocation15 + $0x10] sm:$0xff] }
 0x722   : > { %1693 = vmatpush.msra.mxu1 %v1668_v55 }
 0x723   : > { %v1560_v57 = vadd.f32 %v2221_v53, %v1550_v56  ;;  %v1667_v56 = vld [vmem:[#allocation15 + $0x8] sm:$0xff] }
 0x724   : > { %1694 = vmatpush.msra.mxu1 %v1667_v56 }
 0x725   : > { %v1562_v60 = vadd.f32 %v1560_v57, %v2959_v10  ;;  %v3143_v10 = vsel %vm1575_vm3, %v2261_v6, %v1574_v9  ;;  %v1666_v57 = vld [vmem:[#allocation15] sm:$0xff] }
 0x726   : > { %1695 = vmatpush.msra.mxu1 %v1666_v57 }
 0x727   : > { %v1564_v63 = vsel %vm792_vm0, %v1562_v60, 0.0 }
 0x728   : > { %1565 = vadd.xlane.f32.xlu1 %v1564_v63  ;;  %v1547_v1 = vpop.f32.mrf.mxu3 }
 0x729   : > { %v1551_v2 = vadd.f32 %v1547_v1, %v1385_v61 }
 0x72b   : > { %v1561_v62 = vadd.f32 %v2221_v53, %v1551_v2 }
 0x72d   : > { %v1563_v3 = vadd.f32 %v1561_v62, %v2963_v11  ;;  %v2225_v62 = vld [vmem:[%s3259_s15] ss:$0 sm:$0xff] }
 0x72f   : > { %v1567_v4 = vsel %vm792_vm0, %v1563_v3, 0.0 }
 0x730   : > { %1568 = vadd.xlane.f32.xlu1 %v1567_v4 }
 0x79b   : > { %v1566_v12 = vpop.xlane.xlu1 %1565 }
 0x79c   : > { %v1577_v13 = vmul.f32 %v3143_v10, %v1566_v12 }
 0x79e   : > { %v1579_v14 = vsub.f32 %v1562_v60, %v1577_v13 }
 0x7a0   : > { %v1581_v38 = vmul.f32 %v1579_v14, %v1579_v14 }
 0x7a2   : > { %v1583_v11 = vsel %vm792_vm0, %v1581_v38, 0.0 }
 0x7a3   : > { %1584 = vadd.xlane.f32.xlu2 %v1583_v11  ;;  %v1569_v15 = vpop.xlane.xlu1 %1568 }
 0x7a4   : > { %v1578_v16 = vmul.f32 %v3143_v10, %v1569_v15 }
 0x7a6   : > { %v1580_v18 = vsub.f32 %v1563_v3, %v1578_v16 }
 0x7a8   : > { %v1582_v20 = vmul.f32 %v1580_v18, %v1580_v18 }
 0x7aa   : > { %v1586_v21 = vsel %vm792_vm0, %v1582_v20, 0.0 }
 0x7ab   : > { %1587 = vadd.xlane.f32.xlu0 %v1586_v21 }
 0x7bf   : > { %1769 = vperm.xlu0 %2217, %v2227_v25  }
 0x816   : > { %v1585_v27 = vpop.xlane.xlu2 %1584 }
 0x817   : > { %v1589_v29 = vmul.f32 %v1585_v27, %v3143_v10 }
 0x819   : > { %v1591_v30 = vadd.f32 1e-05, %v1589_v29 }
 0x81b   : > { %2262 = vrsqrt.f32 %v1591_v30  ;;  %vm1599_vm5 = vweird.f32 %v1591_v30 }
 0x81e   : > { %v1588_v32 = vpop.xlane.xlu0 %1587 }
 0x81f   : > { %v1590_v35 = vmul.f32 %v1588_v32, %v3143_v10 }
 0x821   : > { %v2263_v37 = vpop.eup %2262  ;;  %v1592_v39 = vadd.f32 1e-05, %v1590_v35 }
 0x822   : > { %v1594_v40 = vmul.f32 %v2263_v37, %v1591_v30  ;;  %vm1600_vm4 = vweird.f32 %v2263_v37 }
 0x823   : > { %2264 = vrsqrt.f32 %v1592_v39  ;;  %vm1601_vm6 = vmor %vm1599_vm5, %vm1600_vm4  ;;  %vm1609_vm8 = vweird.f32 %v1592_v39 }
 0x824   : > { %v1595_v41 = vmul.f32 %v2263_v37, %v1594_v40 }
 0x826   : > { %v1596_v28 = vmul.f32 0.5, %v1595_v41 }
 0x828   : > { %v1597_v54 = vsub.f32 1.5, %v1596_v28 }
 0x829   : > { %v2265_v42 = vpop.eup %2264 }
 0x82a   : > { %v1598_v43 = vmul.f32 %v2263_v37, %v1597_v54  ;;  %v1604_v34 = vmul.f32 %v2265_v42, %v1592_v39  ;;  %vm1610_vm7 = vweird.f32 %v2265_v42 }
 0x82b   : > { %vm1611_vm9 = vmor %vm1609_vm8, %vm1610_vm7 }
 0x82c   : > { %v1602_v45 = vsel %vm1601_vm6, %v2263_v37, %v1598_v43  ;;  %v1605_v46 = vmul.f32 %v2265_v42, %v1604_v34 }
 0x82d   : > { %v1613_v17 = vmul.f32 %v1602_v45, %v1579_v14 }
 0x82e   : > { %v1606_v48 = vmul.f32 0.5, %v1605_v46  ;;  %v2226_v46 = vld [vmem:[%s3319_s26] ss:$0 sm:$0xff] }
 0x82f   : > { %v1619_v49 = vmul.f32 %v3154_v44, %v1613_v17 }
 0x830   : > { %v1607_v50 = vsub.f32 1.5, %v1606_v48 }
 0x831   : > { %v1625_v19 = vadd.f32 %v3159_v47, %v1619_v49 }
 0x832   : > { %v1608_v51 = vmul.f32 %v2265_v42, %v1607_v50 }
 0x833   : > { %2068 = vmatmul.msk.f32.vlgmr.msra.gmra.mxu0 %vm792_vm0, %v1625_v19 }
 0x834   : > { %v1612_v33 = vsel %vm1611_vm9, %v2265_v42, %v1608_v51 }
 0x835   : > { %v1614_v23 = vmul.f32 %v1612_v33, %v1580_v18 }
 0x837   : > { %v1620_v52 = vmul.f32 %v3154_v44, %v1614_v23 }
 0x839   : > { %v1626_v53 = vadd.f32 %v3159_v47, %v1620_v52 }
 0x83b   : > { %2069 = vmatmul.msk.f32.gmra.mxu0 %vm792_vm0, %v1626_v53 }
 0x8b0   : > { %v1658_v59 = vpop.f32.mrf.mxu0 }
 0x8b1   : > { %v1659_v60 = vadd.f32 %v2224_v58, %v1658_v59 }
 0x8b3   : > { %v1664_v61 = vmax.f32 %v1659_v60, 0.0 }
 0x8b5   : > { %2070 = vmatmul.msk.f32.vlgmr.msra.gmra.mxu1 %vm792_vm0, %v1664_v61 }
 0x8b8   : > { %v1661_v63 = vpop.f32.mrf.mxu0 }
 0x8b9   : > { %v1662_v1 = vadd.f32 %v2224_v58, %v1661_v63 }
 0x8bb   : > { %v1665_v2 = vmax.f32 %v1662_v1, 0.0 }
 0x8bd   : > { %2071 = vmatmul.msk.f32.gmra.mxu1 %vm792_vm0, %v1665_v2 }
 0x932   : > { %v1697_v3 = vpop.f32.mrf.mxu1 }
 0x933   : > { %v1698_v4 = vadd.f32 %v2225_v62, %v1697_v3 }
 0x935   : > { %v1703_v5 = vadd.f32 %v1698_v4, %v1625_v19 }
 0x937   : > { %v1705_v6 = vsel %vm792_vm0, %v1703_v5, 0.0 }
 0x938   : > { %1706 = vadd.xlane.f32.xlu1 %v1705_v6 }
 0x93a   : > { %v1700_v7 = vpop.f32.mrf.mxu1 }
 0x93b   : > { %v1701_v8 = vadd.f32 %v2225_v62, %v1700_v7 }
 0x93d   : > { %v1704_v0 = vadd.f32 %v1701_v8, %v1626_v53 }
 0x93f   : > { %v1708_v9 = vsel %vm792_vm0, %v1704_v0, 0.0 }
 0x940   : > { %1709 = vadd.xlane.f32.xlu1 %v1708_v9 }
 0x9ab   : > { %v1707_v12 = vpop.xlane.xlu1 %1706 }
 0x9ac   : > { %v1711_v13 = vmul.f32 %v1707_v12, %v3143_v10 }
 0x9ae   : > { %v1713_v14 = vsub.f32 %v1703_v5, %v1711_v13 }
 0x9b0   : > { %v1715_v38 = vmul.f32 %v1713_v14, %v1713_v14 }
 0x9b2   : > { %v1717_v11 = vsel %vm792_vm0, %v1715_v38, 0.0 }
 0x9b3   : > { %1718 = vadd.xlane.f32.xlu1 %v1717_v11  ;;  %v1710_v15 = vpop.xlane.xlu1 %1709 }
 0x9b4   : > { %v1712_v16 = vmul.f32 %v1710_v15, %v3143_v10 }
 0x9b6   : > { %v1714_v18 = vsub.f32 %v1704_v0, %v1712_v16 }
 0x9b8   : > { %v1716_v20 = vmul.f32 %v1714_v18, %v1714_v18 }
 0x9ba   : > { %v1720_v21 = vsel %vm792_vm0, %v1716_v20, 0.0 }
 0x9bb   : > { %1721 = vadd.xlane.f32.xlu1 %v1720_v21 }
 0xa26   : > { %v1719_v24 = vpop.xlane.xlu1 %1718 }
 0xa27   : > { %v1723_v26 = vmul.f32 %v1719_v24, %v3143_v10 }
 0xa29   : > { %v1725_v27 = vadd.f32 1e-05, %v1723_v26 }
 0xa2b   : > { %2266 = vrsqrt.f32 %v1725_v27  ;;  %vm1733_vm11 = vweird.f32 %v1725_v27 }
 0xa2e   : > { %v1722_v29 = vpop.xlane.xlu1 %1721 }
 0xa2f   : > { %v1724_v30 = vmul.f32 %v1722_v29, %v3143_v10 }
 0xa31   : > { %v2267_v31 = vpop.eup %2266  ;;  %v1726_v32 = vadd.f32 1e-05, %v1724_v30 }
 0xa32   : > { %v1728_v35 = vmul.f32 %v2267_v31, %v1725_v27  ;;  %vm1734_vm10 = vweird.f32 %v2267_v31 }
 0xa33   : > { %2268 = vrsqrt.f32 %v1726_v32  ;;  %vm1735_vm12 = vmor %vm1733_vm11, %vm1734_vm10  ;;  %vm1743_vm14 = vweird.f32 %v1726_v32 }
 0xa34   : > { %v1729_v37 = vmul.f32 %v2267_v31, %v1728_v35 }
 0xa36   : > { %v1730_v39 = vmul.f32 0.5, %v1729_v37 }
 0xa38   : > { %v1731_v40 = vsub.f32 1.5, %v1730_v39 }
 0xa39   : > { %v2269_v41 = vpop.eup %2268 }
 0xa3a   : > { %v1732_v28 = vmul.f32 %v2267_v31, %v1731_v40  ;;  %v1738_v54 = vmul.f32 %v2269_v41, %v1726_v32  ;;  %vm1744_vm13 = vweird.f32 %v2269_v41 }
 0xa3b   : > { %vm1745_vm15 = vmor %vm1743_vm14, %vm1744_vm13 }
 0xa3c   : > { %v1736_v42 = vsel %vm1735_vm12, %v2267_v31, %v1732_v28  ;;  %v1739_v43 = vmul.f32 %v2269_v41, %v1738_v54 }
 0xa3d   : > { %v1747_v34 = vmul.f32 %v1736_v42, %v1713_v14 }
 0xa3e   : > { %v1740_v45 = vmul.f32 0.5, %v1739_v43 }
 0xa3f   : > { %v1749_v10 = vmul.f32 %v3154_v44, %v1747_v34 }
 0xa40   : > { %v1741_v17 = vsub.f32 1.5, %v1740_v45 }
 0xa41   : > { %v1751_v48 = vadd.f32 %v3159_v47, %v1749_v10 }
 0xa42   : > { %v1742_v49 = vmul.f32 %v2269_v41, %v1741_v17 }
 0xa43   : > { %v1757_v50 = vmul.f32 %v2226_v46, %v1751_v48 }
 0xa44   : > { %v1746_v19 = vsel %vm1745_vm15, %v2269_v41, %v1742_v49 }
 0xa45   : > { %v1759_v51 = vsel %vm792_vm0, %v1757_v50, 0.0  ;;  %v1748_v33 = vmul.f32 %v1746_v19, %v1714_v18 }
 0xa46   : > { %1760 = vadd.xlane.f32.xlu1 %v1759_v51 }
 0xa47   : > { %v1750_v23 = vmul.f32 %v3154_v44, %v1748_v33 }
 0xa49   : > { %v1752_v52 = vadd.f32 %v3159_v47, %v1750_v23 }
 0xa4b   : > { %v1758_v53 = vmul.f32 %v2226_v46, %v1752_v52 }
 0xa4d   : > { %v1762_v55 = vsel %vm792_vm0, %v1758_v53, 0.0 }
 0xa4e   : > { %1763 = vadd.xlane.f32.xlu2 %v1762_v55 }
 0xa4f   : > { %2537 = shalt.err (!%p2534_p5)
}
 0xa50   : > { %s2643_s29 = smov 128   ;;  %s2644_s4 = smov 8   ;;  %v1770_v44 = vpop.permute.xlu0 %1769  ;;  %vm1778_vm0 = vcmask 1041409   ;;  %vm1781_vm1 = vcmask 58368  }
 0xa51   : > { %2115 = dma.vmem_to_hbm [thread:$0]  (%p2863_p4), %s1816_s18, 256, %s1818_s19, %s1789_s17, %s2643_s29, %s2643_s29, %s2644_s4  }
 0xa52   : > { %s2028_s26 = sshll.u32 %s2922_s2, 1  ;;  %s2074_s16 = sshll.u32 %s2772_s25, 1 }
 0xa53   : > { %s3322_s8 = sld [smem:[#allocation44_spill]]  ;;  %s769_s12 = scalar_lea.vmem [#allocation17], %s2028_s26 }
 0xa54   : > { %s1801_s14 = sshll.u32 %s769_s12, 4  ;;  %s1784_s25 = scalar_lea.sflag [#allocation5], %s2922_s2  ;;  %s1802_s14 = int_to_ptr.vmem [resolvable:$true] %s1801_s14 }
 0xa59   : > { %s1799_s24 = scalar_lea.hbm %s3322_s8, %s2074_s16  ;;  %s2558_s23 = scalar_lea.hbm %s3322_s8, 4 }
 0xa5a   : > { %s1803_s20 = sshll.u32 %s1799_s24, 4  ;;  %s1804_s20 = int_to_ptr.hbm [resolvable:$true] %s1803_s20 }
 0xa5b   : > { %s2552_s18 = sshra.s32 %s1804_s20, 4  ;;  %s2553_s18 = int_to_ptr.hbm [resolvable:$true] %s2552_s18 }
 0xa5c   : > { %s2554_s19 = scalar_lea.hbm %s2553_s18, 2  ;;  %p2559_p0 = scmp.lt.s32.totalorder %s2553_s18, %s3322_s8 }
 0xa5d   : > { %p2555_p10 = scmp.ne.s32.totalorder %s2553_s18, %s2554_s19  ;;  %p2560_p2 = scmp.lt.s32.totalorder %s2558_s23, %s2554_s19 }
 0xa5f   : > { %p2556_p11 = pnand %p2555_p10, %p2863_p4  ;;  %p2561_p1 = por %p2560_p2, %p2559_p0 }
 0xa61   : > { %p2557_p13 = pneg %p2556_p11 }
 0xa63   : > { %p2562_p3 = pnand %p2561_p1, %p2557_p13 }
 0xab9   : > { %v1761_v47 = vpop.xlane.xlu1 %1760 }
 0xaba   : > { %v1772_v56 = vadd.f32 %v1770_v44, %v1761_v47 }
 0xabc   : > { %v1776_v59 = vperm.slane %v1772_v56, %v3010_v36 }
 0xac1   : > { %v1764_v57 = vpop.xlane.xlu2 %1763 }
 0xac2   : > { %v1773_v58 = vadd.f32 %v1770_v44, %v1764_v57 }
 0xac4   : > { %v1777_v60 = vperm.slane %v1773_v58, %v3010_v36 }
 0xac6   : > { %v1779_v61 = vsel %vm1778_vm0, %v1777_v60, %v1776_v59 }
 0xac7   : > { %1782 = vst.msk [vmem:[%s769_s12] sm:$0x3] %vm1781_vm1, %v1779_v61 }
 0xac8   : > { %2565 = shalt.err (!%p2562_p3)
}
 0xac9   : > { %2114 = dma.vmem_to_hbm [thread:$0]  (%p2863_p4), %s1802_s14, 32, %s1804_s20, %s1784_s25  }
 0xaca PF: > { %s3323_s2 = sld [smem:[#allocation28_spill]]  ;;  %p3325_p12 = scmp.ge.s32.totalorder %s2628_s22, 2 }
 0xacc   : > { %p2145_p7 = pnand %p3325_p12, %p2867_p6 }
 0xace   : > { %p2146_p9 = pneg %p2145_p7 }
 0xad0   : > { %s1832_s26 = sand.u32 1, %s3323_s2  }
 0xad1   : > { %s1833_s16 = scalar_lea.sflag [#allocation5], %s1832_s26 }
 0xad2   : > { %2607 = dma.done.wait (%p2146_p9), %s1833_s16, 32  }
 0xad3   : > { %2609 = vsyncadd (%p2146_p9), %s1833_s16, 4294967264  ;;  %s1843_s28 = scalar_lea.sflag [#allocation19], %s1832_s26 }
 0xad4   : > { %2611 = dma.done.wait (%p2146_p9), %s1843_s28, 256  }
 0xad5   : > { %2613 = vsyncadd (%p2146_p9), %s1843_s28, 4294967040  ;;  %s3326_s22 = sld [smem:[#allocation30_spill]]  ;;  %s3329_s20 = smov %s2620_s21 }
 0xad6   : > { %s3327_s30 = sld [smem:[#allocation29_spill]] }
 0xad7   : > { %s3328_s1 = sld [smem:[#allocation31_spill]] }
 0xadb   : > { %p44_p4 = scmp.ge.s32.totalorder %s3326_s22, 4  }
 0xadc   : > { %s3330_s21 = smov %s3327_s30 }
 0xadd   :  { %46 = sbr.rel (!%p44_p4) target bundleno = 25 (0x19), region = 191 }
 0xae2   :  { %1849 = vsyncpa [#allocation4], 1 }
 0xae3   :  { %1851 = vsyncpa [#allocation4 + $0x1], 1 }
 0xae4   :  { %1852 = vsyncpa [#allocation7], 1 }
 0xae5   :  { %1854 = vsyncpa [#allocation7 + $0x1], 1 }
 0xae6   :  { %1855 = vsyncpa [#allocation10], 1 }
 0xae7   :  { %1856 = vsyncpa [#allocation13], 1 }
 0xae8   :  { %1857 = vsyncpa [#allocation16], 1 }
 0xae9   :  { %1858 = vsyncpa [#allocation5], 1 }
 0xaea   :  { %1860 = vsyncpa [#allocation5 + $0x1], 1 }
 0xaeb   :  { %1861 = vsyncpa [#allocation19], 1 }
 0xaec   :  { %1863 = vsyncpa [#allocation19 + $0x1], 1 }

</bundles_post_ra>
